<compile_context>
chip_gen: v7x
topology: tpu7x:2x2x1
jax: 0.10.0
libtpu: 0.0.40
codegen_flags: <defaults>
</compile_context>

<pallas_src>
import jax
import jax.numpy as jnp
from jax.experimental import pallas as pl
from jax.experimental.pallas import tpu as pltpu


def _round_up(x, m):
    return ((x + m - 1) // m) * m


def _vmem_limit_bytes():
    # v5e / v6e have 128 MiB VMEM per TensorCore; v7x only 64 MiB.
    kind = ""
    try:
        kind = jax.devices()[0].device_kind.lower()
    except Exception:
        pass
    if "v5" in kind or "v6" in kind:
        return 96 * 1024 * 1024
    return 48 * 1024 * 1024          # conservative default (covers v7x's 64 MiB)


# ---------------------------------------------------------------------------
# Parameter prep: fold / zero-pad weights to lane-dense (128-multiple) operands.
# Padded lanes carry exact zeros through the whole stack (zero weights, zero
# shift, tanh(0)=0), so no extra masking is needed.
# ---------------------------------------------------------------------------
def _w2d(w, cin_p, cout_p):
    """[K, Cin, Cout] conv weight -> zero-padded im2col weight [K*Cin_p, Cout_p] bf16."""
    K, ci, co = w.shape
    wp = jnp.zeros((K, cin_p, cout_p), jnp.float32).at[:, :ci, :co].set(w)
    return wp.reshape(K * cin_p, cout_p).astype(jnp.bfloat16)


def _pad_row(a, n):
    """[1, C] scale/shift row -> zero-padded [1, n] f32."""
    return jnp.pad(a.astype(jnp.float32), ((0, 0), (0, n - a.shape[-1])))


def _scatter_label_cols(W, Y_pad, n_ch, nfm, Cp):
    """[Y, n_ch*nfm] label weights -> [Y_pad, n_ch*Cp] matching the padded feature slab."""
    Y = W.shape[0]
    out = jnp.zeros((Y_pad, n_ch * Cp), jnp.float32)
    for c in range(n_ch):
        out = out.at[:Y, c * Cp:c * Cp + nfm].set(W[:, c * nfm:(c + 1) * nfm])
    return out


# ---------------------------------------------------------------------------
# Kernel 1: all filter-size channel stacks fused into one kernel.
#   per channel: base Conv1d(+bias)+tanh -> L x ResidualBlock(conv+BN+tanh,
#                conv+BN, 1x1-conv+BN shortcut, add, tanh)
# One S-tile per grid step; the right halo comes from a small shifted BlockSpec.
# Each channel writes its 128-padded output slice of the shared feature slab.
# ---------------------------------------------------------------------------
def _make_channel_kernel(*, metas, tS, HT_max, HT2, S_orig, Cp):
    def kernel(x_main_ref, x_halo_ref, *rest):
        out_ref = rest[-1]
        prm = rest[:-1]

        # Input window for the widest halo: padded rows [i*tS, (i+1)*tS + HT2).
        xw = jnp.concatenate([x_main_ref[0], x_halo_ref[0]], axis=0)   # (tS+HT2, E_pad)

        # Row validity w.r.t. the original (unpadded) sequence, computed once.
        start = pl.program_id(1) * tS - HT_max
        ridx = start + jax.lax.broadcasted_iota(jnp.int32, (tS + HT2, 1), 0)
        keep_full = jnp.logical_and(ridx >= 0, ridx < S_orig)

        def mask(v, h):
            # rows of v correspond to original [i*tS - h, i*tS + tS + h)
            a = HT_max - h
            return jnp.where(keep_full[a:a + v.shape[0]], v, 0.0)

        p = 0
        for ci, meta in enumerate(metas):
            K, pad, L, HT = meta['K'], meta['pad'], meta['L'], meta['HT']

            def conv(v, w, K=K, pad=pad):
                # "valid" conv via im2col: one MXU matmul, contraction K * Cin_pad.
                rows = v.shape[0] - 2 * pad
                if K > 1:
                    xcol = jnp.concatenate([v[k:k + rows] for k in range(K)], axis=-1)
                else:
                    xcol = v
                return jnp.dot(xcol, w, preferred_element_type=jnp.float32)

            cur = xw[HT_max - HT:HT_max - HT + tS + 2 * HT]
            halo = HT

            # ---- base conv (+bias) + tanh --------------------------------
            wb, sb, bb = prm[p], prm[p + 1], prm[p + 2]
            p += 3
            z = conv(cur, wb[...]) * sb[...] + bb[...]
            halo -= pad
            cur = mask(jnp.tanh(z), halo).astype(jnp.bfloat16)

            # ---- residual blocks ----------------------------------------
            for _ in range(L):
                w1, s1, b1, w2, s2, b2, wsc, ssc, bsc = prm[p:p + 9]
                p += 9
                # left branch: conv1 -> BN1 -> tanh
                h = conv(cur, w1[...]) * s1[...] + b1[...]
                h = mask(jnp.tanh(h), halo - pad).astype(jnp.bfloat16)
                # left branch: conv2 -> BN2
                z2 = conv(h, w2[...]) * s2[...] + b2[...]
                # shortcut: 1x1 conv -> BN on the matching center rows
                rows_out = cur.shape[0] - 4 * pad
                sc = jnp.dot(cur[2 * pad:2 * pad + rows_out], wsc[...],
                             preferred_element_type=jnp.float32)
                sc = sc * ssc[...] + bsc[...]
                halo -= 2 * pad
                # add + tanh (dropout = identity in eval)
                cur = mask(jnp.tanh(z2 + sc), halo).astype(jnp.bfloat16)

            # lane-dense write of this channel's slice of the feature slab
            out_ref[0, :, pl.ds(ci * Cp, Cp)] = cur.astype(out_ref.dtype)

    return kernel


def fused_channels_forward(xp, flat, metas, *, tS, nT, HT_max, HT2, B, S_orig,
                           E_pad, Cp, vmem_limit):
    """xp: zero-padded bf16 input [B, nT*tS + HT2, E_pad] -> [B, nT*tS, n_ch*Cp] bf16."""
    D_pad = len(metas) * Cp
    args = [xp, xp]                              # same array: main tile + small halo
    in_specs = [
        pl.BlockSpec((1, tS, E_pad), lambda b, i: (b, i, 0)),
        pl.BlockSpec((1, HT2, E_pad),
                     lambda b, i, _m=(tS // HT2): (b, (i + 1) * _m, 0)),
    ]
    for a in flat:
        nd = a.ndim
        args.append(a)
        in_specs.append(pl.BlockSpec(a.shape, lambda b, i, _nd=nd: (0,) * _nd))

    kernel = _make_channel_kernel(metas=metas, tS=tS, HT_max=HT_max, HT2=HT2,
                                  S_orig=S_orig, Cp=Cp)
    return pl.pallas_call(
        kernel,
        out_shape=jax.ShapeDtypeStruct((B, nT * tS, D_pad), jnp.bfloat16),
        grid=(B, nT),
        in_specs=in_specs,
        out_specs=pl.BlockSpec((1, tS, D_pad), lambda b, i: (b, i, 0)),
        compiler_params=pltpu.CompilerParams(
            dimension_semantics=("parallel", "parallel"),
            vmem_limit_bytes=vmem_limit),
    )(*args)


# ---------------------------------------------------------------------------
# Kernel 2: OutputLayer — label-wise attention + per-label dot + focal loss.
# Streaming online-softmax over S tiles (grid axis "arbitrary"); labels tiled at
# 128 (Y zero-padded); alpha never materialized:
#     y = (sum_s e*z) * reciprocal(sum_s e) + b
# ---------------------------------------------------------------------------
def _make_output_kernel(*, tS, S_orig, focal_alpha, focal_gamma):
    def kernel(x_ref, u_ref, fw_ref, fb_ref, tgt_ref, y_ref, loss_ref,
               m_sc, den_sc, num_sc):
        s = pl.program_id(1)

        @pl.when(s == 0)
        def _():
            m_sc[...] = jnp.full_like(m_sc, -1e30)
            den_sc[...] = jnp.zeros_like(den_sc)
            num_sc[...] = jnp.zeros_like(num_sc)

        x = x_ref[...]                                               # [B,tS,D] bf16
        att = jnp.einsum('bsd,yd->bsy', x, u_ref[...],
                         preferred_element_type=jnp.float32)         # [B,tS,tY] f32
        z = jnp.einsum('bsd,yd->bsy', x, fw_ref[...],
                       preferred_element_type=jnp.float32)
        # mask padded sequence rows out of the softmax
        row = s * tS + jax.lax.broadcasted_iota(jnp.int32, (1, tS, 1), 1)
        att = jnp.where(row < S_orig, att, -1e30)

        m_new = jnp.maximum(m_sc[...], jnp.max(att, axis=1))         # [B,tY]
        corr = jnp.exp(m_sc[...] - m_new)
        e = jnp.exp(att - m_new[:, None, :])                         # [B,tS,tY]
        den_sc[...] = den_sc[...] * corr + jnp.sum(e, axis=1)
        num_sc[...] = num_sc[...] * corr + jnp.sum(e * z, axis=1)
        m_sc[...] = m_new

        @pl.when(s == pl.num_programs(1) - 1)
        def _():
            y = num_sc[...] * pl.reciprocal(den_sc[...], approx=True) + fb_ref[...]
            y_ref[...] = y
            # focal loss elementwise terms (stable BCE-with-logits, pt = exp(-BCE))
            t = tgt_ref[...]
            bce = jnp.maximum(y, 0.0) - y * t + jnp.log1p(jnp.exp(-jnp.abs(y)))
            pt = jnp.exp(-bce)
            loss_ref[...] = focal_alpha * (1.0 - pt) ** focal_gamma * bce

    return kernel


def output_layer(feat, U_w, final_w, final_b, target, *, tS, S_orig, n_ch, nfm, Cp,
                 focal_alpha, focal_gamma, vmem_limit):
    B, S_pad, D_pad = feat.shape
    Y = U_w.shape[0]
    tY = 128
    Y_pad = _round_up(Y, tY)
    nYt = Y_pad // tY
    nSt = S_pad // tS

    U_p = _scatter_label_cols(U_w, Y_pad, n_ch, nfm, Cp).astype(jnp.bfloat16)
    F_p = _scatter_label_cols(final_w, Y_pad, n_ch, nfm, Cp).astype(jnp.bfloat16)
    fb_p = jnp.pad(final_b.astype(jnp.float32), ((0, 0), (0, Y_pad - Y)))
    tgt_p = jnp.pad(target.astype(jnp.float32), ((0, 0), (0, Y_pad - Y)))

    kernel = _make_output_kernel(tS=tS, S_orig=S_orig, focal_alpha=focal_alpha,
                                 focal_gamma=focal_gamma)
    y_pad, loss_elem = pl.pallas_call(
        kernel,
        out_shape=(jax.ShapeDtypeStruct((B, Y_pad), jnp.float32),
                   jax.ShapeDtypeStruct((B, Y_pad), jnp.float32)),
        grid=(nYt, nSt),                                  # reduction (S) axis last
        in_specs=[
            pl.BlockSpec((B, tS, D_pad), lambda j, s: (0, s, 0)),   # streamed features
            pl.BlockSpec((tY, D_pad), lambda j, s: (j, 0)),         # U rows, label tile
            pl.BlockSpec((tY, D_pad), lambda j, s: (j, 0)),         # final rows
            pl.BlockSpec((1, tY), lambda j, s: (0, j)),             # final bias
            pl.BlockSpec((B, tY), lambda j, s: (0, j)),             # targets
        ],
        out_specs=(pl.BlockSpec((B, tY), lambda j, s: (0, j)),
                   pl.BlockSpec((B, tY), lambda j, s: (0, j))),
        scratch_shapes=[pltpu.VMEM((B, tY), jnp.float32),           # running max
                        pltpu.VMEM((B, tY), jnp.float32),           # running denom
                        pltpu.VMEM((B, tY), jnp.float32)],          # running numerator
        compiler_params=pltpu.CompilerParams(
            dimension_semantics=("parallel", "arbitrary"),
            vmem_limit_bytes=vmem_limit),
    )(feat, U_p, F_p, fb_p, tgt_p)

    # padded labels are sliced out before the mean (they would otherwise bias it)
    return y_pad[:, :Y], jnp.mean(loss_elem[:, :Y])


# ---------------------------------------------------------------------------
# Module composition (MultiResCNN forward)
# ---------------------------------------------------------------------------
def multirescnn_forward(token_ids, target, params):
    channels = params['channels']
    n_ch = len(channels)
    embed = params['embed']
    E = embed.shape[1]
    E_pad = _round_up(E, 128)
    nfm = channels[0]['resblocks'][-1]['w2'].shape[-1]
    Cp = _round_up(nfm, 128)
    vmem = _vmem_limit_bytes()

    # WordRep: embedding gather is plain-JAX glue; embed_drop = identity (eval).
    embed_p = jnp.pad(embed, ((0, 0), (0, E_pad - E)))
    x = embed_p[token_ids].astype(jnp.bfloat16)                     # [B, S, E_pad]
    B, S, _ = x.shape

    # Per-channel receptive-field halo: (2*conv_layer + 1) * (filter_size // 2).
    metas = []
    for ch in channels:
        K = ch['base_w'].shape[0]
        L = len(ch['resblocks'])
        metas.append(dict(K=K, pad=K // 2, L=L, HT=(2 * L + 1) * (K // 2)))
    HT_max = max(m['HT'] for m in metas)
    HT2 = _round_up(max(2 * HT_max, 16), 16)      # halo-block rows (>= 2*HT_max)

    # Sequence tile: target 512 rows, multiple of the halo block size.
    tS = min(512, _round_up(S, 16))
    tS = _round_up(max(tS, HT2), HT2)
    nT = -(-S // tS)
    S_pad = nT * tS
    P = S_pad + HT2                               # room for the last tile's halo block
    xp = jnp.pad(x, ((0, 0), (HT_max, P - HT_max - S), (0, 0)))

    # Fold / pad channel weights to lane-dense bf16 operands (flat arg list).
    flat = []
    for ch in channels:
        flat += [_w2d(ch['base_w'], E_pad, E_pad),
                 _pad_row(ch['base_scale'], E_pad),
                 _pad_row(ch['base_shift'], E_pad)]
        for rb in ch['resblocks']:
            ci, co = rb['w1'].shape[1], rb['w1'].shape[2]
            ci_p, co_p = _round_up(ci, 128), _round_up(co, 128)
            flat += [_w2d(rb['w1'], ci_p, co_p),
                     _pad_row(rb['bn1_scale'], co_p), _pad_row(rb['bn1_shift'], co_p),
                     _w2d(rb['w2'], co_p, co_p),
                     _pad_row(rb['bn2_scale'], co_p), _pad_row(rb['bn2_shift'], co_p),
                     _w2d(rb['wsc'], ci_p, co_p),
                     _pad_row(rb['bnsc_scale'], co_p), _pad_row(rb['bnsc_shift'], co_p)]

    feat = fused_channels_forward(xp, flat, metas, tS=tS, nT=nT, HT_max=HT_max,
                                  HT2=HT2, B=B, S_orig=S, E_pad=E_pad, Cp=Cp,
                                  vmem_limit=vmem)                  # [B, S_pad, n_ch*Cp]

    return output_layer(feat, params['U_w'], params['final_w'], params['final_b'],
                        target, tS=tS, S_orig=S, n_ch=n_ch, nfm=nfm, Cp=Cp,
                        focal_alpha=params['focal_alpha'],
                        focal_gamma=params['focal_gamma'], vmem_limit=vmem)


# ---------------------------------------------------------------------------
# Deterministic parameter init (shapes from the module's __init__)
# ---------------------------------------------------------------------------
def _bn(c):
    eps = 1e-5   # torch BatchNorm1d eval defaults: gamma=1, beta=0, mean=0, var=1
    scale = jnp.full((1, c), 1.0 / (1.0 + eps) ** 0.5, jnp.float32)
    shift = jnp.zeros((1, c), jnp.float32)
    return scale, shift


def init_params(key, *, vocab, embed_size, Y, filter_sizes, num_filter_maps,
                conv_layer):
    conv_dict = {1: [embed_size, num_filter_maps],
                 2: [embed_size, 100, num_filter_maps],
                 3: [embed_size, 150, 100, num_filter_maps],
                 4: [embed_size, 200, 150, 100, num_filter_maps]}
    dims = conv_dict[conv_layer]
    keys = iter(jax.random.split(key, 128))

    def xavier(shape, fan_in, fan_out):
        lim = (6.0 / (fan_in + fan_out)) ** 0.5
        return jax.random.uniform(next(keys), shape, jnp.float32, -lim, lim)

    embed = jax.random.normal(next(keys), (vocab, embed_size), jnp.float32) * 0.1
    embed = embed.at[0].set(0.0)                   # padding_idx = 0

    channels = []
    for fs in filter_sizes:
        base_w = xavier((fs, embed_size, embed_size),
                        embed_size * fs, embed_size * fs)
        base_b = jax.random.uniform(next(keys), (1, embed_size), jnp.float32,
                                    -0.05, 0.05)
        resblocks = []
        for idx in range(conv_layer):
            cin, cout = dims[idx], dims[idx + 1]
            s1, b1 = _bn(cout)
            s2, b2 = _bn(cout)
            ssc, bsc = _bn(cout)
            resblocks.append(dict(
                w1=xavier((fs, cin, cout), cin * fs, cout * fs),
                bn1_scale=s1, bn1_shift=b1,
                w2=xavier((fs, cout, cout), cout * fs, cout * fs),
                bn2_scale=s2, bn2_shift=b2,
                wsc=xavier((1, cin, cout), cin, cout),
                bnsc_scale=ssc, bnsc_shift=bsc,
            ))
        channels.append(dict(base_w=base_w,
                             base_scale=jnp.ones((1, embed_size), jnp.float32),
                             base_shift=base_b,
                             resblocks=resblocks))

    D = len(filter_sizes) * num_filter_maps
    return dict(
        embed=embed, channels=channels,
        U_w=xavier((Y, D), D, Y),
        final_w=xavier((Y, D), D, Y),
        final_b=jax.random.uniform(next(keys), (1, Y), jnp.float32, -0.05, 0.05),
        focal_alpha=1.0, focal_gamma=2,   # args.alpha=1, args.gamma=2, reduce=True
    )


if __name__ == "__main__":
    B, S = 2, 16                 # batch, sequence length
    vocab, embed_size = 50, 32   # args.embed_size (== feature_size, no elmo)
    Y = 8                        # number of labels
    filter_sizes = (3, 5)        # args.filter_size = "3,5" (odd sizes only)
    num_filter_maps = 32         # args.num_filter_maps
    conv_layer = 1               # args.conv_layer

    key = jax.random.PRNGKey(0)
    kp, kx, kt = jax.random.split(key, 3)
    params = init_params(kp, vocab=vocab, embed_size=embed_size, Y=Y,
                         filter_sizes=filter_sizes,
                         num_filter_maps=num_filter_maps, conv_layer=conv_layer)
    token_ids = jax.random.randint(kx, (B, S), 0, vocab, jnp.int32)
    target = jax.random.bernoulli(kt, 0.3, (B, Y)).astype(jnp.float32)

    y, loss = multirescnn_forward(token_ids, target, params)
    jax.block_until_ready((y, loss))
    assert y.shape == (B, Y) and loss.shape == ()
    assert bool(jnp.isfinite(loss))
    print("KERNEL_OK")
</pallas_src>

<mosaic_0001>
module attributes {stable_mosaic.version = 11 : i64} {
  func.func @kernel(%arg0: i32, %arg1: i32, %arg2: memref<1x16x128xbf16, #tpu.memory_space<vmem>>, %arg3: memref<1x16x128xbf16, #tpu.memory_space<vmem>>, %arg4: memref<384x128xbf16, #tpu.memory_space<vmem>>, %arg5: memref<1x128xf32, #tpu.memory_space<vmem>>, %arg6: memref<1x128xf32, #tpu.memory_space<vmem>>, %arg7: memref<384x128xbf16, #tpu.memory_space<vmem>>, %arg8: memref<1x128xf32, #tpu.memory_space<vmem>>, %arg9: memref<1x128xf32, #tpu.memory_space<vmem>>, %arg10: memref<384x128xbf16, #tpu.memory_space<vmem>>, %arg11: memref<1x128xf32, #tpu.memory_space<vmem>>, %arg12: memref<1x128xf32, #tpu.memory_space<vmem>>, %arg13: memref<128x128xbf16, #tpu.memory_space<vmem>>, %arg14: memref<1x128xf32, #tpu.memory_space<vmem>>, %arg15: memref<1x128xf32, #tpu.memory_space<vmem>>, %arg16: memref<640x128xbf16, #tpu.memory_space<vmem>>, %arg17: memref<1x128xf32, #tpu.memory_space<vmem>>, %arg18: memref<1x128xf32, #tpu.memory_space<vmem>>, %arg19: memref<640x128xbf16, #tpu.memory_space<vmem>>, %arg20: memref<1x128xf32, #tpu.memory_space<vmem>>, %arg21: memref<1x128xf32, #tpu.memory_space<vmem>>, %arg22: memref<640x128xbf16, #tpu.memory_space<vmem>>, %arg23: memref<1x128xf32, #tpu.memory_space<vmem>>, %arg24: memref<1x128xf32, #tpu.memory_space<vmem>>, %arg25: memref<128x128xbf16, #tpu.memory_space<vmem>>, %arg26: memref<1x128xf32, #tpu.memory_space<vmem>>, %arg27: memref<1x128xf32, #tpu.memory_space<vmem>>, %arg28: memref<1x16x256xbf16, #tpu.memory_space<vmem>>) attributes {dimension_semantics = [#tpu.dimension_semantics<parallel>, #tpu.dimension_semantics<parallel>], iteration_bounds = array<i64: 2, 1>, scalar_prefetch = 0 : i64, scratch_operands = 0 : i64, tpu.core_type = #tpu.core_type<tc>, window_params = [{transform_indices = @transform_0, window_bounds = array<i64: 1, 16, 128>}, {transform_indices = @transform_1, window_bounds = array<i64: 1, 16, 128>}, {pipeline_mode = #tpu.pipeline_mode<synchronous>, transform_indices = @transform_2, window_bounds = array<i64: 384, 128>}, {pipeline_mode = #tpu.pipeline_mode<synchronous>, transform_indices = @transform_3, window_bounds = array<i64: 1, 128>}, {pipeline_mode = #tpu.pipeline_mode<synchronous>, transform_indices = @transform_4, window_bounds = array<i64: 1, 128>}, {pipeline_mode = #tpu.pipeline_mode<synchronous>, transform_indices = @transform_5, window_bounds = array<i64: 384, 128>}, {pipeline_mode = #tpu.pipeline_mode<synchronous>, transform_indices = @transform_6, window_bounds = array<i64: 1, 128>}, {pipeline_mode = #tpu.pipeline_mode<synchronous>, transform_indices = @transform_7, window_bounds = array<i64: 1, 128>}, {pipeline_mode = #tpu.pipeline_mode<synchronous>, transform_indices = @transform_8, window_bounds = array<i64: 384, 128>}, {pipeline_mode = #tpu.pipeline_mode<synchronous>, transform_indices = @transform_9, window_bounds = array<i64: 1, 128>}, {pipeline_mode = #tpu.pipeline_mode<synchronous>, transform_indices = @transform_10, window_bounds = array<i64: 1, 128>}, {pipeline_mode = #tpu.pipeline_mode<synchronous>, transform_indices = @transform_11, window_bounds = array<i64: 128, 128>}, {pipeline_mode = #tpu.pipeline_mode<synchronous>, transform_indices = @transform_12, window_bounds = array<i64: 1, 128>}, {pipeline_mode = #tpu.pipeline_mode<synchronous>, transform_indices = @transform_13, window_bounds = array<i64: 1, 128>}, {pipeline_mode = #tpu.pipeline_mode<synchronous>, transform_indices = @transform_14, window_bounds = array<i64: 640, 128>}, {pipeline_mode = #tpu.pipeline_mode<synchronous>, transform_indices = @transform_15, window_bounds = array<i64: 1, 128>}, {pipeline_mode = #tpu.pipeline_mode<synchronous>, transform_indices = @transform_16, window_bounds = array<i64: 1, 128>}, {pipeline_mode = #tpu.pipeline_mode<synchronous>, transform_indices = @transform_17, window_bounds = array<i64: 640, 128>}, {pipeline_mode = #tpu.pipeline_mode<synchronous>, transform_indices = @transform_18, window_bounds = array<i64: 1, 128>}, {pipeline_mode = #tpu.pipeline_mode<synchronous>, transform_indices = @transform_19, window_bounds = array<i64: 1, 128>}, {pipeline_mode = #tpu.pipeline_mode<synchronous>, transform_indices = @transform_20, window_bounds = array<i64: 640, 128>}, {pipeline_mode = #tpu.pipeline_mode<synchronous>, transform_indices = @transform_21, window_bounds = array<i64: 1, 128>}, {pipeline_mode = #tpu.pipeline_mode<synchronous>, transform_indices = @transform_22, window_bounds = array<i64: 1, 128>}, {pipeline_mode = #tpu.pipeline_mode<synchronous>, transform_indices = @transform_23, window_bounds = array<i64: 128, 128>}, {pipeline_mode = #tpu.pipeline_mode<synchronous>, transform_indices = @transform_24, window_bounds = array<i64: 1, 128>}, {pipeline_mode = #tpu.pipeline_mode<synchronous>, transform_indices = @transform_25, window_bounds = array<i64: 1, 128>}, {transform_indices = @transform_26, window_bounds = array<i64: 1, 16, 256>}]} {
    %c0 = arith.constant 0 : index
    %c0_0 = arith.constant 0 : index
    %c0_1 = arith.constant 0 : index
    %0 = vector.load %arg2[%c0, %c0_0, %c0_1] : memref<1x16x128xbf16, #tpu.memory_space<vmem>>, vector<1x16x128xbf16>
    %1 = vector.shape_cast %0 : vector<1x16x128xbf16> to vector<16x128xbf16>
    %c0_2 = arith.constant 0 : index
    %c0_3 = arith.constant 0 : index
    %c0_4 = arith.constant 0 : index
    %2 = vector.load %arg3[%c0_2, %c0_3, %c0_4] : memref<1x16x128xbf16, #tpu.memory_space<vmem>>, vector<1x16x128xbf16>
    %3 = vector.shape_cast %2 : vector<1x16x128xbf16> to vector<16x128xbf16>
    %4 = tpu.concatenate %1, %3 in 0 : vector<16x128xbf16>, vector<16x128xbf16> -> vector<32x128xbf16>
    %c16_i32 = arith.constant 16 : i32
    %5 = arith.muli %arg1, %c16_i32 : i32
    %c6_i32 = arith.constant 6 : i32
    %6 = arith.subi %5, %c6_i32 : i32
    %7 = tpu.iota {dimensions = array<i32: 0>} : vector<32x1xi32>
    %8 = vector.broadcast %6 : i32 to vector<32x1xi32>
    %9 = arith.addi %8, %7 : vector<32x1xi32>
    %c0_i32 = arith.constant 0 : i32
    %10 = vector.broadcast %c0_i32 : i32 to vector<32x1xi32>
    %11 = arith.cmpi sge, %9, %10 : vector<32x1xi32>
    %c16_i32_5 = arith.constant 16 : i32
    %12 = vector.broadcast %c16_i32_5 : i32 to vector<32x1xi32>
    %13 = arith.cmpi slt, %9, %12 : vector<32x1xi32>
    %14 = arith.andi %11, %13 : vector<32x1xi1>
    %15 = vector.extract_strided_slice %4 {offsets = [3, 0], sizes = [22, 128], strides = [1, 1]} : vector<32x128xbf16> to vector<22x128xbf16>
    %c0_6 = arith.constant 0 : index
    %c0_7 = arith.constant 0 : index
    %16 = vector.load %arg4[%c0_6, %c0_7] : memref<384x128xbf16, #tpu.memory_space<vmem>>, vector<384x128xbf16>
    %17 = vector.extract_strided_slice %15 {offsets = [0, 0], sizes = [20, 128], strides = [1, 1]} : vector<22x128xbf16> to vector<20x128xbf16>
    %18 = vector.extract_strided_slice %15 {offsets = [1, 0], sizes = [20, 128], strides = [1, 1]} : vector<22x128xbf16> to vector<20x128xbf16>
    %19 = vector.extract_strided_slice %15 {offsets = [2, 0], sizes = [20, 128], strides = [1, 1]} : vector<22x128xbf16> to vector<20x128xbf16>
    %20 = tpu.concatenate %17, %18, %19 in 1 : vector<20x128xbf16>, vector<20x128xbf16>, vector<20x128xbf16> -> vector<20x384xbf16>
    %cst = arith.constant dense<0.000000e+00> : vector<20x128xf32>
    %21 = tpu.matmul %20, %16, %cst {dimension_numbers = #tpu.dot_dimension_numbers<[1], [0], [0], [1], [0, 0, 1, 1], [], []>} : vector<20x384xbf16>, vector<384x128xbf16>, vector<20x128xf32> -> vector<20x128xf32>
    %c0_8 = arith.constant 0 : index
    %c0_9 = arith.constant 0 : index
    %22 = vector.load %arg5[%c0_8, %c0_9] : memref<1x128xf32, #tpu.memory_space<vmem>>, vector<1x128xf32>
    %23 = vector.broadcast %22 : vector<1x128xf32> to vector<20x128xf32>
    %24 = arith.mulf %21, %23 : vector<20x128xf32>
    %c0_10 = arith.constant 0 : index
    %c0_11 = arith.constant 0 : index
    %25 = vector.load %arg6[%c0_10, %c0_11] : memref<1x128xf32, #tpu.memory_space<vmem>>, vector<1x128xf32>
    %26 = vector.broadcast %25 : vector<1x128xf32> to vector<20x128xf32>
    %27 = arith.addf %24, %26 : vector<20x128xf32>
    %28 = math.tanh %27 : vector<20x128xf32>
    %29 = vector.extract_strided_slice %14 {offsets = [4, 0], sizes = [20, 1], strides = [1, 1]} : vector<32x1xi1> to vector<20x1xi1>
    %cst_12 = arith.constant 0.000000e+00 : f32
    %30 = vector.shape_cast %29 : vector<20x1xi1> to vector<20x1xi1>
    %31 = vector.broadcast %30 : vector<20x1xi1> to vector<20x128xi1>
    %32 = vector.broadcast %cst_12 : f32 to vector<20x128xf32>
    %33 = arith.select %31, %28, %32 : vector<20x128xi1>, vector<20x128xf32>
    %34 = arith.truncf %33 : vector<20x128xf32> to vector<20x128xbf16>
    %c0_13 = arith.constant 0 : index
    %c0_14 = arith.constant 0 : index
    %35 = vector.load %arg7[%c0_13, %c0_14] : memref<384x128xbf16, #tpu.memory_space<vmem>>, vector<384x128xbf16>
    %36 = vector.extract_strided_slice %34 {offsets = [0, 0], sizes = [18, 128], strides = [1, 1]} : vector<20x128xbf16> to vector<18x128xbf16>
    %37 = vector.extract_strided_slice %34 {offsets = [1, 0], sizes = [18, 128], strides = [1, 1]} : vector<20x128xbf16> to vector<18x128xbf16>
    %38 = vector.extract_strided_slice %34 {offsets = [2, 0], sizes = [18, 128], strides = [1, 1]} : vector<20x128xbf16> to vector<18x128xbf16>
    %39 = tpu.concatenate %36, %37, %38 in 1 : vector<18x128xbf16>, vector<18x128xbf16>, vector<18x128xbf16> -> vector<18x384xbf16>
    %cst_15 = arith.constant dense<0.000000e+00> : vector<18x128xf32>
    %40 = tpu.matmul %39, %35, %cst_15 {dimension_numbers = #tpu.dot_dimension_numbers<[1], [0], [0], [1], [0, 0, 1, 1], [], []>} : vector<18x384xbf16>, vector<384x128xbf16>, vector<18x128xf32> -> vector<18x128xf32>
    %c0_16 = arith.constant 0 : index
    %c0_17 = arith.constant 0 : index
    %41 = vector.load %arg8[%c0_16, %c0_17] : memref<1x128xf32, #tpu.memory_space<vmem>>, vector<1x128xf32>
    %42 = vector.broadcast %41 : vector<1x128xf32> to vector<18x128xf32>
    %43 = arith.mulf %40, %42 : vector<18x128xf32>
    %c0_18 = arith.constant 0 : index
    %c0_19 = arith.constant 0 : index
    %44 = vector.load %arg9[%c0_18, %c0_19] : memref<1x128xf32, #tpu.memory_space<vmem>>, vector<1x128xf32>
    %45 = vector.broadcast %44 : vector<1x128xf32> to vector<18x128xf32>
    %46 = arith.addf %43, %45 : vector<18x128xf32>
    %47 = math.tanh %46 : vector<18x128xf32>
    %48 = vector.extract_strided_slice %14 {offsets = [5, 0], sizes = [18, 1], strides = [1, 1]} : vector<32x1xi1> to vector<18x1xi1>
    %cst_20 = arith.constant 0.000000e+00 : f32
    %49 = vector.shape_cast %48 : vector<18x1xi1> to vector<18x1xi1>
    %50 = vector.broadcast %49 : vector<18x1xi1> to vector<18x128xi1>
    %51 = vector.broadcast %cst_20 : f32 to vector<18x128xf32>
    %52 = arith.select %50, %47, %51 : vector<18x128xi1>, vector<18x128xf32>
    %53 = arith.truncf %52 : vector<18x128xf32> to vector<18x128xbf16>
    %c0_21 = arith.constant 0 : index
    %c0_22 = arith.constant 0 : index
    %54 = vector.load %arg10[%c0_21, %c0_22] : memref<384x128xbf16, #tpu.memory_space<vmem>>, vector<384x128xbf16>
    %55 = vector.extract_strided_slice %53 {offsets = [0, 0], sizes = [16, 128], strides = [1, 1]} : vector<18x128xbf16> to vector<16x128xbf16>
    %56 = vector.extract_strided_slice %53 {offsets = [1, 0], sizes = [16, 128], strides = [1, 1]} : vector<18x128xbf16> to vector<16x128xbf16>
    %57 = vector.extract_strided_slice %53 {offsets = [2, 0], sizes = [16, 128], strides = [1, 1]} : vector<18x128xbf16> to vector<16x128xbf16>
    %58 = tpu.concatenate %55, %56, %57 in 1 : vector<16x128xbf16>, vector<16x128xbf16>, vector<16x128xbf16> -> vector<16x384xbf16>
    %cst_23 = arith.constant dense<0.000000e+00> : vector<16x128xf32>
    %59 = tpu.matmul %58, %54, %cst_23 {dimension_numbers = #tpu.dot_dimension_numbers<[1], [0], [0], [1], [0, 0, 1, 1], [], []>} : vector<16x384xbf16>, vector<384x128xbf16>, vector<16x128xf32> -> vector<16x128xf32>
    %c0_24 = arith.constant 0 : index
    %c0_25 = arith.constant 0 : index
    %60 = vector.load %arg11[%c0_24, %c0_25] : memref<1x128xf32, #tpu.memory_space<vmem>>, vector<1x128xf32>
    %61 = vector.broadcast %60 : vector<1x128xf32> to vector<16x128xf32>
    %62 = arith.mulf %59, %61 : vector<16x128xf32>
    %c0_26 = arith.constant 0 : index
    %c0_27 = arith.constant 0 : index
    %63 = vector.load %arg12[%c0_26, %c0_27] : memref<1x128xf32, #tpu.memory_space<vmem>>, vector<1x128xf32>
    %64 = vector.broadcast %63 : vector<1x128xf32> to vector<16x128xf32>
    %65 = arith.addf %62, %64 : vector<16x128xf32>
    %66 = vector.extract_strided_slice %34 {offsets = [2, 0], sizes = [16, 128], strides = [1, 1]} : vector<20x128xbf16> to vector<16x128xbf16>
    %c0_28 = arith.constant 0 : index
    %c0_29 = arith.constant 0 : index
    %67 = vector.load %arg13[%c0_28, %c0_29] : memref<128x128xbf16, #tpu.memory_space<vmem>>, vector<128x128xbf16>
    %cst_30 = arith.constant dense<0.000000e+00> : vector<16x128xf32>
    %68 = tpu.matmul %66, %67, %cst_30 {dimension_numbers = #tpu.dot_dimension_numbers<[1], [0], [0], [1], [0, 0, 1, 1], [], []>} : vector<16x128xbf16>, vector<128x128xbf16>, vector<16x128xf32> -> vector<16x128xf32>
    %c0_31 = arith.constant 0 : index
    %c0_32 = arith.constant 0 : index
    %69 = vector.load %arg14[%c0_31, %c0_32] : memref<1x128xf32, #tpu.memory_space<vmem>>, vector<1x128xf32>
    %70 = vector.broadcast %69 : vector<1x128xf32> to vector<16x128xf32>
    %71 = arith.mulf %68, %70 : vector<16x128xf32>
    %c0_33 = arith.constant 0 : index
    %c0_34 = arith.constant 0 : index
    %72 = vector.load %arg15[%c0_33, %c0_34] : memref<1x128xf32, #tpu.memory_space<vmem>>, vector<1x128xf32>
    %73 = vector.broadcast %72 : vector<1x128xf32> to vector<16x128xf32>
    %74 = arith.addf %71, %73 : vector<16x128xf32>
    %75 = arith.addf %65, %74 : vector<16x128xf32>
    %76 = math.tanh %75 : vector<16x128xf32>
    %77 = vector.extract_strided_slice %14 {offsets = [6, 0], sizes = [16, 1], strides = [1, 1]} : vector<32x1xi1> to vector<16x1xi1>
    %cst_35 = arith.constant 0.000000e+00 : f32
    %78 = vector.shape_cast %77 : vector<16x1xi1> to vector<16x1xi1>
    %79 = vector.broadcast %78 : vector<16x1xi1> to vector<16x128xi1>
    %80 = vector.broadcast %cst_35 : f32 to vector<16x128xf32>
    %81 = arith.select %79, %76, %80 : vector<16x128xi1>, vector<16x128xf32>
    %82 = arith.truncf %81 : vector<16x128xf32> to vector<16x128xbf16>
    %c0_36 = arith.constant 0 : index
    %c0_37 = arith.constant 0 : index
    %c0_38 = arith.constant 0 : index
    %83 = vector.load %arg28[%c0_36, %c0_37, %c0_38] : memref<1x16x256xbf16, #tpu.memory_space<vmem>>, vector<1x16x128xbf16>
    %84 = vector.shape_cast %83 : vector<1x16x128xbf16> to vector<16x128xbf16>
    %85 = vector.shape_cast %82 : vector<16x128xbf16> to vector<1x16x128xbf16>
    tpu.vector_store %arg28[%c0_36, %c0_37, %c0_38], %85 {strides = array<i32>} : memref<1x16x256xbf16, #tpu.memory_space<vmem>>, vector<1x16x128xbf16>,
    %86 = vector.extract_strided_slice %4 {offsets = [0, 0], sizes = [28, 128], strides = [1, 1]} : vector<32x128xbf16> to vector<28x128xbf16>
    %c0_39 = arith.constant 0 : index
    %c0_40 = arith.constant 0 : index
    %87 = vector.load %arg16[%c0_39, %c0_40] : memref<640x128xbf16, #tpu.memory_space<vmem>>, vector<640x128xbf16>
    %88 = vector.extract_strided_slice %86 {offsets = [0, 0], sizes = [24, 128], strides = [1, 1]} : vector<28x128xbf16> to vector<24x128xbf16>
    %89 = vector.extract_strided_slice %86 {offsets = [1, 0], sizes = [24, 128], strides = [1, 1]} : vector<28x128xbf16> to vector<24x128xbf16>
    %90 = vector.extract_strided_slice %86 {offsets = [2, 0], sizes = [24, 128], strides = [1, 1]} : vector<28x128xbf16> to vector<24x128xbf16>
    %91 = vector.extract_strided_slice %86 {offsets = [3, 0], sizes = [24, 128], strides = [1, 1]} : vector<28x128xbf16> to vector<24x128xbf16>
    %92 = vector.extract_strided_slice %86 {offsets = [4, 0], sizes = [24, 128], strides = [1, 1]} : vector<28x128xbf16> to vector<24x128xbf16>
    %93 = tpu.concatenate %88, %89, %90, %91, %92 in 1 : vector<24x128xbf16>, vector<24x128xbf16>, vector<24x128xbf16>, vector<24x128xbf16>, vector<24x128xbf16> -> vector<24x640xbf16>
    %cst_41 = arith.constant dense<0.000000e+00> : vector<24x128xf32>
    %94 = tpu.matmul %93, %87, %cst_41 {dimension_numbers = #tpu.dot_dimension_numbers<[1], [0], [0], [1], [0, 0, 1, 1], [], []>} : vector<24x640xbf16>, vector<640x128xbf16>, vector<24x128xf32> -> vector<24x128xf32>
    %c0_42 = arith.constant 0 : index
    %c0_43 = arith.constant 0 : index
    %95 = vector.load %arg17[%c0_42, %c0_43] : memref<1x128xf32, #tpu.memory_space<vmem>>, vector<1x128xf32>
    %96 = vector.broadcast %95 : vector<1x128xf32> to vector<24x128xf32>
    %97 = arith.mulf %94, %96 : vector<24x128xf32>
    %c0_44 = arith.constant 0 : index
    %c0_45 = arith.constant 0 : index
    %98 = vector.load %arg18[%c0_44, %c0_45] : memref<1x128xf32, #tpu.memory_space<vmem>>, vector<1x128xf32>
    %99 = vector.broadcast %98 : vector<1x128xf32> to vector<24x128xf32>
    %100 = arith.addf %97, %99 : vector<24x128xf32>
    %101 = math.tanh %100 : vector<24x128xf32>
    %102 = vector.extract_strided_slice %14 {offsets = [2, 0], sizes = [24, 1], strides = [1, 1]} : vector<32x1xi1> to vector<24x1xi1>
    %cst_46 = arith.constant 0.000000e+00 : f32
    %103 = vector.shape_cast %102 : vector<24x1xi1> to vector<24x1xi1>
    %104 = vector.broadcast %103 : vector<24x1xi1> to vector<24x128xi1>
    %105 = vector.broadcast %cst_46 : f32 to vector<24x128xf32>
    %106 = arith.select %104, %101, %105 : vector<24x128xi1>, vector<24x128xf32>
    %107 = arith.truncf %106 : vector<24x128xf32> to vector<24x128xbf16>
    %c0_47 = arith.constant 0 : index
    %c0_48 = arith.constant 0 : index
    %108 = vector.load %arg19[%c0_47, %c0_48] : memref<640x128xbf16, #tpu.memory_space<vmem>>, vector<640x128xbf16>
    %109 = vector.extract_strided_slice %107 {offsets = [0, 0], sizes = [20, 128], strides = [1, 1]} : vector<24x128xbf16> to vector<20x128xbf16>
    %110 = vector.extract_strided_slice %107 {offsets = [1, 0], sizes = [20, 128], strides = [1, 1]} : vector<24x128xbf16> to vector<20x128xbf16>
    %111 = vector.extract_strided_slice %107 {offsets = [2, 0], sizes = [20, 128], strides = [1, 1]} : vector<24x128xbf16> to vector<20x128xbf16>
    %112 = vector.extract_strided_slice %107 {offsets = [3, 0], sizes = [20, 128], strides = [1, 1]} : vector<24x128xbf16> to vector<20x128xbf16>
    %113 = vector.extract_strided_slice %107 {offsets = [4, 0], sizes = [20, 128], strides = [1, 1]} : vector<24x128xbf16> to vector<20x128xbf16>
    %114 = tpu.concatenate %109, %110, %111, %112, %113 in 1 : vector<20x128xbf16>, vector<20x128xbf16>, vector<20x128xbf16>, vector<20x128xbf16>, vector<20x128xbf16> -> vector<20x640xbf16>
    %cst_49 = arith.constant dense<0.000000e+00> : vector<20x128xf32>
    %115 = tpu.matmul %114, %108, %cst_49 {dimension_numbers = #tpu.dot_dimension_numbers<[1], [0], [0], [1], [0, 0, 1, 1], [], []>} : vector<20x640xbf16>, vector<640x128xbf16>, vector<20x128xf32> -> vector<20x128xf32>
    %c0_50 = arith.constant 0 : index
    %c0_51 = arith.constant 0 : index
    %116 = vector.load %arg20[%c0_50, %c0_51] : memref<1x128xf32, #tpu.memory_space<vmem>>, vector<1x128xf32>
    %117 = vector.broadcast %116 : vector<1x128xf32> to vector<20x128xf32>
    %118 = arith.mulf %115, %117 : vector<20x128xf32>
    %c0_52 = arith.constant 0 : index
    %c0_53 = arith.constant 0 : index
    %119 = vector.load %arg21[%c0_52, %c0_53] : memref<1x128xf32, #tpu.memory_space<vmem>>, vector<1x128xf32>
    %120 = vector.broadcast %119 : vector<1x128xf32> to vector<20x128xf32>
    %121 = arith.addf %118, %120 : vector<20x128xf32>
    %122 = math.tanh %121 : vector<20x128xf32>
    %123 = vector.extract_strided_slice %14 {offsets = [4, 0], sizes = [20, 1], strides = [1, 1]} : vector<32x1xi1> to vector<20x1xi1>
    %cst_54 = arith.constant 0.000000e+00 : f32
    %124 = vector.shape_cast %123 : vector<20x1xi1> to vector<20x1xi1>
    %125 = vector.broadcast %124 : vector<20x1xi1> to vector<20x128xi1>
    %126 = vector.broadcast %cst_54 : f32 to vector<20x128xf32>
    %127 = arith.select %125, %122, %126 : vector<20x128xi1>, vector<20x128xf32>
    %128 = arith.truncf %127 : vector<20x128xf32> to vector<20x128xbf16>
    %c0_55 = arith.constant 0 : index
    %c0_56 = arith.constant 0 : index
    %129 = vector.load %arg22[%c0_55, %c0_56] : memref<640x128xbf16, #tpu.memory_space<vmem>>, vector<640x128xbf16>
    %130 = vector.extract_strided_slice %128 {offsets = [0, 0], sizes = [16, 128], strides = [1, 1]} : vector<20x128xbf16> to vector<16x128xbf16>
    %131 = vector.extract_strided_slice %128 {offsets = [1, 0], sizes = [16, 128], strides = [1, 1]} : vector<20x128xbf16> to vector<16x128xbf16>
    %132 = vector.extract_strided_slice %128 {offsets = [2, 0], sizes = [16, 128], strides = [1, 1]} : vector<20x128xbf16> to vector<16x128xbf16>
    %133 = vector.extract_strided_slice %128 {offsets = [3, 0], sizes = [16, 128], strides = [1, 1]} : vector<20x128xbf16> to vector<16x128xbf16>
    %134 = vector.extract_strided_slice %128 {offsets = [4, 0], sizes = [16, 128], strides = [1, 1]} : vector<20x128xbf16> to vector<16x128xbf16>
    %135 = tpu.concatenate %130, %131, %132, %133, %134 in 1 : vector<16x128xbf16>, vector<16x128xbf16>, vector<16x128xbf16>, vector<16x128xbf16>, vector<16x128xbf16> -> vector<16x640xbf16>
    %cst_57 = arith.constant dense<0.000000e+00> : vector<16x128xf32>
    %136 = tpu.matmul %135, %129, %cst_57 {dimension_numbers = #tpu.dot_dimension_numbers<[1], [0], [0], [1], [0, 0, 1, 1], [], []>} : vector<16x640xbf16>, vector<640x128xbf16>, vector<16x128xf32> -> vector<16x128xf32>
    %c0_58 = arith.constant 0 : index
    %c0_59 = arith.constant 0 : index
    %137 = vector.load %arg23[%c0_58, %c0_59] : memref<1x128xf32, #tpu.memory_space<vmem>>, vector<1x128xf32>
    %138 = vector.broadcast %137 : vector<1x128xf32> to vector<16x128xf32>
    %139 = arith.mulf %136, %138 : vector<16x128xf32>
    %c0_60 = arith.constant 0 : index
    %c0_61 = arith.constant 0 : index
    %140 = vector.load %arg24[%c0_60, %c0_61] : memref<1x128xf32, #tpu.memory_space<vmem>>, vector<1x128xf32>
    %141 = vector.broadcast %140 : vector<1x128xf32> to vector<16x128xf32>
    %142 = arith.addf %139, %141 : vector<16x128xf32>
    %143 = vector.extract_strided_slice %107 {offsets = [4, 0], sizes = [16, 128], strides = [1, 1]} : vector<24x128xbf16> to vector<16x128xbf16>
    %c0_62 = arith.constant 0 : index
    %c0_63 = arith.constant 0 : index
    %144 = vector.load %arg25[%c0_62, %c0_63] : memref<128x128xbf16, #tpu.memory_space<vmem>>, vector<128x128xbf16>
    %cst_64 = arith.constant dense<0.000000e+00> : vector<16x128xf32>
    %145 = tpu.matmul %143, %144, %cst_64 {dimension_numbers = #tpu.dot_dimension_numbers<[1], [0], [0], [1], [0, 0, 1, 1], [], []>} : vector<16x128xbf16>, vector<128x128xbf16>, vector<16x128xf32> -> vector<16x128xf32>
    %c0_65 = arith.constant 0 : index
    %c0_66 = arith.constant 0 : index
    %146 = vector.load %arg26[%c0_65, %c0_66] : memref<1x128xf32, #tpu.memory_space<vmem>>, vector<1x128xf32>
    %147 = vector.broadcast %146 : vector<1x128xf32> to vector<16x128xf32>
    %148 = arith.mulf %145, %147 : vector<16x128xf32>
    %c0_67 = arith.constant 0 : index
    %c0_68 = arith.constant 0 : index
    %149 = vector.load %arg27[%c0_67, %c0_68] : memref<1x128xf32, #tpu.memory_space<vmem>>, vector<1x128xf32>
    %150 = vector.broadcast %149 : vector<1x128xf32> to vector<16x128xf32>
    %151 = arith.addf %148, %150 : vector<16x128xf32>
    %152 = arith.addf %142, %151 : vector<16x128xf32>
    %153 = math.tanh %152 : vector<16x128xf32>
    %154 = vector.extract_strided_slice %14 {offsets = [6, 0], sizes = [16, 1], strides = [1, 1]} : vector<32x1xi1> to vector<16x1xi1>
    %cst_69 = arith.constant 0.000000e+00 : f32
    %155 = vector.shape_cast %154 : vector<16x1xi1> to vector<16x1xi1>
    %156 = vector.broadcast %155 : vector<16x1xi1> to vector<16x128xi1>
    %157 = vector.broadcast %cst_69 : f32 to vector<16x128xf32>
    %158 = arith.select %156, %153, %157 : vector<16x128xi1>, vector<16x128xf32>
    %159 = arith.truncf %158 : vector<16x128xf32> to vector<16x128xbf16>
    %c0_70 = arith.constant 0 : index
    %c0_71 = arith.constant 0 : index
    %c128 = arith.constant 128 : index
    %160 = vector.load %arg28[%c0_70, %c0_71, %c128] : memref<1x16x256xbf16, #tpu.memory_space<vmem>>, vector<1x16x128xbf16>
    %161 = vector.shape_cast %160 : vector<1x16x128xbf16> to vector<16x128xbf16>
    %162 = vector.shape_cast %159 : vector<16x128xbf16> to vector<1x16x128xbf16>
    tpu.vector_store %arg28[%c0_70, %c0_71, %c128], %162 {strides = array<i32>} : memref<1x16x256xbf16, #tpu.memory_space<vmem>>, vector<1x16x128xbf16>,
    return
  }
  func.func @transform_0(%arg0: i32, %arg1: i32) -> (i32, i32, i32) {
    %c0_i32 = arith.constant 0 : i32
    %c0_i32_0 = arith.constant 0 : i32
    return %arg0, %arg1, %c0_i32 : i32, i32, i32
  }
  func.func @transform_1(%arg0: i32, %arg1: i32) -> (i32, i32, i32) {
    %c1_i32 = arith.constant 1 : i32
    %0 = arith.addi %arg1, %c1_i32 : i32
    %c1_i32_0 = arith.constant 1 : i32
    %1 = arith.muli %0, %c1_i32_0 : i32
    %c0_i32 = arith.constant 0 : i32
    %c0_i32_1 = arith.constant 0 : i32
    return %arg0, %1, %c0_i32 : i32, i32, i32
  }
  func.func @transform_2(%arg0: i32, %arg1: i32) -> (i32, i32) {
    %c0_i32 = arith.constant 0 : i32
    %c0_i32_0 = arith.constant 0 : i32
    %c0_i32_1 = arith.constant 0 : i32
    return %c0_i32, %c0_i32_0 : i32, i32
  }
  func.func @transform_3(%arg0: i32, %arg1: i32) -> (i32, i32) {
    %c0_i32 = arith.constant 0 : i32
    %c0_i32_0 = arith.constant 0 : i32
    %c0_i32_1 = arith.constant 0 : i32
    return %c0_i32, %c0_i32_0 : i32, i32
  }
  func.func @transform_4(%arg0: i32, %arg1: i32) -> (i32, i32) {
    %c0_i32 = arith.constant 0 : i32
    %c0_i32_0 = arith.constant 0 : i32
    %c0_i32_1 = arith.constant 0 : i32
    return %c0_i32, %c0_i32_0 : i32, i32
  }
  func.func @transform_5(%arg0: i32, %arg1: i32) -> (i32, i32) {
    %c0_i32 = arith.constant 0 : i32
    %c0_i32_0 = arith.constant 0 : i32
    %c0_i32_1 = arith.constant 0 : i32
    return %c0_i32, %c0_i32_0 : i32, i32
  }
  func.func @transform_6(%arg0: i32, %arg1: i32) -> (i32, i32) {
    %c0_i32 = arith.constant 0 : i32
    %c0_i32_0 = arith.constant 0 : i32
    %c0_i32_1 = arith.constant 0 : i32
    return %c0_i32, %c0_i32_0 : i32, i32
  }
  func.func @transform_7(%arg0: i32, %arg1: i32) -> (i32, i32) {
    %c0_i32 = arith.constant 0 : i32
    %c0_i32_0 = arith.constant 0 : i32
    %c0_i32_1 = arith.constant 0 : i32
    return %c0_i32, %c0_i32_0 : i32, i32
  }
  func.func @transform_8(%arg0: i32, %arg1: i32) -> (i32, i32) {
    %c0_i32 = arith.constant 0 : i32
    %c0_i32_0 = arith.constant 0 : i32
    %c0_i32_1 = arith.constant 0 : i32
    return %c0_i32, %c0_i32_0 : i32, i32
  }
  func.func @transform_9(%arg0: i32, %arg1: i32) -> (i32, i32) {
    %c0_i32 = arith.constant 0 : i32
    %c0_i32_0 = arith.constant 0 : i32
    %c0_i32_1 = arith.constant 0 : i32
    return %c0_i32, %c0_i32_0 : i32, i32
  }
  func.func @transform_10(%arg0: i32, %arg1: i32) -> (i32, i32) {
    %c0_i32 = arith.constant 0 : i32
    %c0_i32_0 = arith.constant 0 : i32
    %c0_i32_1 = arith.constant 0 : i32
    return %c0_i32, %c0_i32_0 : i32, i32
  }
  func.func @transform_11(%arg0: i32, %arg1: i32) -> (i32, i32) {
    %c0_i32 = arith.constant 0 : i32
    %c0_i32_0 = arith.constant 0 : i32
    %c0_i32_1 = arith.constant 0 : i32
    return %c0_i32, %c0_i32_0 : i32, i32
  }
  func.func @transform_12(%arg0: i32, %arg1: i32) -> (i32, i32) {
    %c0_i32 = arith.constant 0 : i32
    %c0_i32_0 = arith.constant 0 : i32
    %c0_i32_1 = arith.constant 0 : i32
    return %c0_i32, %c0_i32_0 : i32, i32
  }
  func.func @transform_13(%arg0: i32, %arg1: i32) -> (i32, i32) {
    %c0_i32 = arith.constant 0 : i32
    %c0_i32_0 = arith.constant 0 : i32
    %c0_i32_1 = arith.constant 0 : i32
    return %c0_i32, %c0_i32_0 : i32, i32
  }
  func.func @transform_14(%arg0: i32, %arg1: i32) -> (i32, i32) {
    %c0_i32 = arith.constant 0 : i32
    %c0_i32_0 = arith.constant 0 : i32
    %c0_i32_1 = arith.constant 0 : i32
    return %c0_i32, %c0_i32_0 : i32, i32
  }
  func.func @transform_15(%arg0: i32, %arg1: i32) -> (i32, i32) {
    %c0_i32 = arith.constant 0 : i32
    %c0_i32_0 = arith.constant 0 : i32
    %c0_i32_1 = arith.constant 0 : i32
    return %c0_i32, %c0_i32_0 : i32, i32
  }
  func.func @transform_16(%arg0: i32, %arg1: i32) -> (i32, i32) {
    %c0_i32 = arith.constant 0 : i32
    %c0_i32_0 = arith.constant 0 : i32
    %c0_i32_1 = arith.constant 0 : i32
    return %c0_i32, %c0_i32_0 : i32, i32
  }
  func.func @transform_17(%arg0: i32, %arg1: i32) -> (i32, i32) {
    %c0_i32 = arith.constant 0 : i32
    %c0_i32_0 = arith.constant 0 : i32
    %c0_i32_1 = arith.constant 0 : i32
    return %c0_i32, %c0_i32_0 : i32, i32
  }
  func.func @transform_18(%arg0: i32, %arg1: i32) -> (i32, i32) {
    %c0_i32 = arith.constant 0 : i32
    %c0_i32_0 = arith.constant 0 : i32
    %c0_i32_1 = arith.constant 0 : i32
    return %c0_i32, %c0_i32_0 : i32, i32
  }
  func.func @transform_19(%arg0: i32, %arg1: i32) -> (i32, i32) {
    %c0_i32 = arith.constant 0 : i32
    %c0_i32_0 = arith.constant 0 : i32
    %c0_i32_1 = arith.constant 0 : i32
    return %c0_i32, %c0_i32_0 : i32, i32
  }
  func.func @transform_20(%arg0: i32, %arg1: i32) -> (i32, i32) {
    %c0_i32 = arith.constant 0 : i32
    %c0_i32_0 = arith.constant 0 : i32
    %c0_i32_1 = arith.constant 0 : i32
    return %c0_i32, %c0_i32_0 : i32, i32
  }
  func.func @transform_21(%arg0: i32, %arg1: i32) -> (i32, i32) {
    %c0_i32 = arith.constant 0 : i32
    %c0_i32_0 = arith.constant 0 : i32
    %c0_i32_1 = arith.constant 0 : i32
    return %c0_i32, %c0_i32_0 : i32, i32
  }
  func.func @transform_22(%arg0: i32, %arg1: i32) -> (i32, i32) {
    %c0_i32 = arith.constant 0 : i32
    %c0_i32_0 = arith.constant 0 : i32
    %c0_i32_1 = arith.constant 0 : i32
    return %c0_i32, %c0_i32_0 : i32, i32
  }
  func.func @transform_23(%arg0: i32, %arg1: i32) -> (i32, i32) {
    %c0_i32 = arith.constant 0 : i32
    %c0_i32_0 = arith.constant 0 : i32
    %c0_i32_1 = arith.constant 0 : i32
    return %c0_i32, %c0_i32_0 : i32, i32
  }
  func.func @transform_24(%arg0: i32, %arg1: i32) -> (i32, i32) {
    %c0_i32 = arith.constant 0 : i32
    %c0_i32_0 = arith.constant 0 : i32
    %c0_i32_1 = arith.constant 0 : i32
    return %c0_i32, %c0_i32_0 : i32, i32
  }
  func.func @transform_25(%arg0: i32, %arg1: i32) -> (i32, i32) {
    %c0_i32 = arith.constant 0 : i32
    %c0_i32_0 = arith.constant 0 : i32
    %c0_i32_1 = arith.constant 0 : i32
    return %c0_i32, %c0_i32_0 : i32, i32
  }
  func.func @transform_26(%arg0: i32, %arg1: i32) -> (i32, i32, i32) {
    %c0_i32 = arith.constant 0 : i32
    %c0_i32_0 = arith.constant 0 : i32
    return %arg0, %arg1, %c0_i32 : i32, i32, i32
  }
}

</mosaic_0001>

<bundles_post_ra>
// kernel: tpu_custom_call.1
= control target key start
LH: loop header
LB: loop body
LE: loop exit
PB: predicated region body
PF: predicated region fallthrough
CT: control target
= control target key end

     0   :  { %s6582_s0 = inlined_call_operand.hbm [shape: bf16[2,32,128], index: 0, kind: input, shape index: {}]   ;;  %s6583_s1 = inlined_call_operand.hbm [shape: bf16[2,32,128], index: 1, kind: input, shape index: {}]   ;;  %s6584_s2 = inlined_call_operand.hbm [shape: bf16[384,128], index: 2, kind: input, shape index: {}]   ;;  %s6585_s3 = inlined_call_operand.vmem [shape: f32[1,128], index: 3, kind: input, shape index: {}]   ;;  %s6586_s4 = inlined_call_operand.vmem [shape: f32[1,128], index: 4, kind: input, shape index: {}]   ;;  %s6587_s5 = inlined_call_operand.hbm [shape: bf16[384,128], index: 5, kind: input, shape index: {}]   ;;  %s6588_s6 = inlined_call_operand.vmem [shape: f32[1,128], index: 6, kind: input, shape index: {}]   ;;  %s6589_s7 = inlined_call_operand.vmem [shape: f32[1,128], index: 7, kind: input, shape index: {}]   ;;  %s6590_s8 = inlined_call_operand.hbm [shape: bf16[384,128], index: 8, kind: input, shape index: {}]   ;;  %s6591_s9 = inlined_call_operand.vmem [shape: f32[1,128], index: 9, kind: input, shape index: {}]   ;;  %s6592_s10 = inlined_call_operand.vmem [shape: f32[1,128], index: 10, kind: input, shape index: {}]   ;;  %s6593_s11 = inlined_call_operand.hbm [shape: bf16[128,128], index: 11, kind: input, shape index: {}]   ;;  %s6594_s12 = inlined_call_operand.vmem [shape: f32[1,128], index: 12, kind: input, shape index: {}]   ;;  %s6595_s13 = inlined_call_operand.vmem [shape: f32[1,128], index: 13, kind: input, shape index: {}]   ;;  %s6596_s14 = inlined_call_operand.hbm [shape: bf16[640,128], index: 14, kind: input, shape index: {}]   ;;  %s6597_s15 = inlined_call_operand.vmem [shape: f32[1,128], index: 15, kind: input, shape index: {}]   ;;  %s6598_s16 = inlined_call_operand.vmem [shape: f32[1,128], index: 16, kind: input, shape index: {}]   ;;  %s6599_s17 = inlined_call_operand.hbm [shape: bf16[640,128], index: 17, kind: input, shape index: {}]   ;;  %s6600_s18 = inlined_call_operand.vmem [shape: f32[1,128], index: 18, kind: input, shape index: {}]   ;;  %s6601_s19 = inlined_call_operand.vmem [shape: f32[1,128], index: 19, kind: input, shape index: {}]   ;;  %s6602_s20 = inlined_call_operand.hbm [shape: bf16[640,128], index: 20, kind: input, shape index: {}]   ;;  %s6603_s21 = inlined_call_operand.vmem [shape: f32[1,128], index: 21, kind: input, shape index: {}]   ;;  %s6604_s22 = inlined_call_operand.vmem [shape: f32[1,128], index: 22, kind: input, shape index: {}]   ;;  %s6605_s23 = inlined_call_operand.vmem [shape: bf16[128,128], index: 23, kind: input, shape index: {}]   ;;  %s6606_s24 = inlined_call_operand.vmem [shape: f32[1,128], index: 24, kind: input, shape index: {}]   ;;  %s6607_s25 = inlined_call_operand.vmem [shape: f32[1,128], index: 25, kind: input, shape index: {}]   ;;  %s6608_s26 = inlined_call_operand.hbm [shape: bf16[2,16,256], index: 26, kind: output, shape index: {}]  }
   0x1   :  { %6629 = sst [smem:[#allocation29_spill]] %s6582_s0 }
   0x2   :  { %6630 = sst [smem:[#allocation30_spill]] %s6583_s1 }
   0x3   :  { %6631 = sst [smem:[#allocation31_spill]] %s6584_s2 }
   0x4   :  { %6632 = sst [smem:[#allocation32_spill]] %s6585_s3 }
   0x5   :  { %6633 = sst [smem:[#allocation33_spill]] %s6586_s4 }
   0x6   :  { %6634 = sst [smem:[#allocation34_spill]] %s6587_s5 }
   0x7   :  { %6635 = sst [smem:[#allocation35_spill]] %s6588_s6 }
   0x8   :  { %6636 = sst [smem:[#allocation36_spill]] %s6589_s7 }
   0x9   :  { %6637 = sst [smem:[#allocation37_spill]] %s6590_s8 }
   0xa   :  { %6638 = sst [smem:[#allocation38_spill]] %s6591_s9 }
   0xb   :  { %6639 = sst [smem:[#allocation39_spill]] %s6592_s10 }
   0xc   :  { %6640 = sst [smem:[#allocation40_spill]] %s6593_s11 }
   0xd   :  { %6641 = sst [smem:[#allocation41_spill]] %s6596_s14 }
   0xe   :  { %6642 = sst [smem:[#allocation42_spill]] %s6597_s15 }
   0xf   :  { %6643 = sst [smem:[#allocation43_spill]] %s6598_s16 }
  0x10   :  { %6644 = sst [smem:[#allocation44_spill]] %s6599_s17 }
  0x11   :  { %6645 = sst [smem:[#allocation45_spill]] %s6600_s18 }
  0x12   :  { %6646 = sst [smem:[#allocation46_spill]] %s6601_s19 }
  0x13   :  { %6647 = sst [smem:[#allocation47_spill]] %s6602_s20 }
  0x14   :  { %6648 = sst [smem:[#allocation48_spill]] %s6603_s21 }
  0x15   :  { %6649 = sst [smem:[#allocation49_spill]] %s6604_s22 }
  0x16   :  { %6650 = sst [smem:[#allocation50_spill]] %s6605_s23 }
  0x17   :  { %6651 = sst [smem:[#allocation51_spill]] %s6606_s24 }
  0x18   :  { %6652 = sst [smem:[#allocation52_spill]] %s6607_s25 }
  0x19   :  { %6653 = sst [smem:[#allocation53_spill]] %s6608_s26 }
  0x1a   :  { %31 = vsyncpa [#allocation3], 0 }
  0x1b   :  { %33 = vsyncpa [#allocation3 + $0x1], 0 }
  0x1c   :  { %34 = vsyncpa [#allocation6], 0 }
  0x1d   :  { %36 = vsyncpa [#allocation6 + $0x1], 0 }
  0x1e   :  { %37 = vsyncpa [#allocation9], 0 }
  0x1f   :  { %38 = vsyncpa [#allocation12], 0 }
  0x20   :  { %39 = vsyncpa [#allocation15], 0 }
  0x21   :  { %40 = vsyncpa [#allocation4], 0 }
  0x22   :  { %42 = vsyncpa [#allocation4 + $0x1], 0  ;;  %s5898_s27 = smov 0   ;;  %s5900_s3 = smov 0  }
  0x23   :  { %s5902_s7 = smov 0   ;;  %s5904_s28 = smov 0  }
  0x24   :  { %s5906_s8 = smov 0   ;;  %s5908_s4 = smov 0  }
  0x25 LB: > { %6654 = sst [smem:[#allocation25_spill]] %s5737_s28  ;;  %s5929_s29 = sadd.s32 4294967295, %s5745_s4   ;;  %s5745_s4 = sphi %s5908_s4, %s48_s4   ;;  %s5741_s8 = sphi %s5906_s8, %s6713_s8   ;;  %s5737_s28 = sphi %s5904_s28, %s6712_s28   ;;  %s5733_s7 = sphi %s5902_s7, %s6716_s7   ;;  %s5729_s3 = sphi %s5900_s3, %s6715_s3   ;;  %s5725_s27 = sphi %s5898_s27, %s6714_s27  }
  0x26   : > { %6655 = sst [smem:[#allocation26_spill]] %s5741_s8  ;;  %p4254_p0 = scmp.ge.s32.totalorder %s5745_s4, 1 }
  0x27   : > { %p6616_p1 = scmp.eq.s32.totalorder %s5929_s29, 0  ;;  %p655_p2 = scmp.lt.s32.totalorder %s5745_s4, 3 }
  0x28   : > { %s5747_s9 = smov [#allocation7]   ;;  %s5748_s5 = smov [#allocation8]  }
  0x29   : > { %p5934_p3 = pnand %p4254_p0, %p655_p2  ;;  %s667_s30 = sshll.u32 %s5747_s9, 4  ;;  %s5938_s30 = int_to_ptr.vmem [resolvable:$true] %s667_s30 }
  0x2a   : > { %s686_s10 = sshll.u32 %s5748_s5, 4  ;;  %s5749_s6 = smov [#allocation11]   ;;  %s5949_s10 = int_to_ptr.vmem [resolvable:$true] %s686_s10 }
  0x2b   : > { %s6656_s0 = scalar_select %p5934_p3, 1, 0 }
  0x2c   : > { %p5032_p4 = pneg %p5934_p3  ;;  %s5951_s1 = sshll.u32 %s5749_s6, 4  ;;  %s725_s1 = int_to_ptr.vmem [resolvable:$true] %s5951_s1 }
  0x2d   : > { %s6658_s28 = sld [smem:[#allocation31_spill]] }
  0x2e   : > { %p5945_p6 = pnand %p5032_p4, %p6616_p1 }
  0x30   : > { %p5961_p8 = pneg %p5945_p6 }
  0x33   : > { %s6659_s22 = smov %s6658_s28  ;;  %s5386_s25 = scalar_lea.hbm %s6658_s28, 3072 }
  0x34   : > { %p5387_p7 = scmp.ne.s32.totalorder %s6659_s22, %s5386_s25  ;;  %p5393_p11 = scmp.lt.u32.totalorder %s5386_s25, %s6659_s22 }
  0x36   : > { %p5389_p9 = pnand %p5961_p8, %p5387_p7 }
  0x38   : > { %p5390_p10 = pneg %p5389_p9 }
  0x3a   : > { %p5395_p12 = pnand %p5393_p11, %p5390_p10 }
  0x3c   : > { %5398 = shalt.err (!%p5395_p12)
}
  0x3d   : > { %s5399_s21 = scalar_lea.vmem %s5938_s30, 3072  ;;  %p5407_p4 = scmp.lt.s32.totalorder %s5938_s30, %s5938_s30 }
  0x3e   : > { %p5400_p13 = scmp.ne.s32.totalorder %s5938_s30, %s5399_s21  ;;  %p5408_p5 = scmp.lt.s32.totalorder %s5399_s21, %s5399_s21 }
  0x40   : > { %p5402_p0 = pnand %p5400_p13, %p5961_p8  ;;  %p5409_p7 = por %p5408_p5, %p5407_p4 }
  0x42   : > { %p5403_p2 = pneg %p5402_p0 }
  0x44   : > { %p5410_p9 = pnand %p5409_p7, %p5403_p2 }
  0x46   : > { %5413 = shalt.err (!%p5410_p9)
}
  0x47   : > { %s6619_s24 = smov 64   ;;  %s6621_s25 = smov 4  }
  0x48   : > { %5035 = dma.hbm_to_vmem [thread:$0]  (!%p5945_p6), %s6659_s22, 3072, %s5938_s30, [#allocation6], %s6619_s24, %s6619_s24, %s6621_s25  }
  0x49   : > { %s6661_s6 = sld [smem:[#allocation34_spill]] }
  0x4f   : > { %s5414_s21 = scalar_lea.hbm %s6661_s6, 3072 }
  0x50   : > { %p5415_p5 = scmp.ne.s32.totalorder %s6661_s6, %s5414_s21  ;;  %p5421_p12 = scmp.lt.u32.totalorder %s5414_s21, %s6661_s6 }
  0x52   : > { %p5417_p10 = pnand %p5415_p5, %p5961_p8 }
  0x54   : > { %p5418_p11 = pneg %p5417_p10 }
  0x56   : > { %p5423_p13 = pnand %p5421_p12, %p5418_p11 }
  0x58   : > { %5426 = shalt.err (!%p5423_p13)
}
  0x59   : > { %s5427_s30 = scalar_lea.vmem %s5949_s10, 3072  ;;  %p5435_p7 = scmp.lt.s32.totalorder %s5949_s10, %s5949_s10 }
  0x5a   : > { %p5428_p0 = scmp.ne.s32.totalorder %s5949_s10, %s5427_s30  ;;  %p5436_p9 = scmp.lt.s32.totalorder %s5427_s30, %s5427_s30 }
  0x5c   : > { %p5430_p2 = pnand %p5428_p0, %p5961_p8  ;;  %p5437_p5 = por %p5436_p9, %p5435_p7 }
  0x5e   : > { %p5431_p4 = pneg %p5430_p2 }
  0x60   : > { %p5438_p10 = pnand %p5437_p5, %p5431_p4 }
  0x62   : > { %5441 = shalt.err (!%p5438_p10)
}
  0x63   : > { %5038 = dma.hbm_to_vmem [thread:$0]  (!%p5945_p6), %s6661_s6, 3072, %s5949_s10, [#allocation9], %s6619_s24, %s6619_s24, %s6621_s25  }
  0x64   : > { %s6662_s11 = sld [smem:[#allocation40_spill]] }
  0x6a   : > { %s5442_s26 = scalar_lea.hbm %s6662_s11, 1024 }
  0x6b   : > { %p5443_p11 = scmp.ne.s32.totalorder %s6662_s11, %s5442_s26  ;;  %p5449_p0 = scmp.lt.u32.totalorder %s5442_s26, %s6662_s11 }
  0x6d   : > { %p5445_p12 = pnand %p5443_p11, %p5961_p8 }
  0x6f   : > { %p5446_p13 = pneg %p5445_p12 }
  0x71   : > { %p5451_p2 = pnand %p5449_p0, %p5446_p13 }
  0x73   : > { %5454 = shalt.err (!%p5451_p2)
}
  0x74   : > { %s5455_s30 = scalar_lea.vmem %s725_s1, 1024  ;;  %p5463_p5 = scmp.lt.s32.totalorder %s725_s1, %s725_s1 }
  0x75   : > { %p5456_p4 = scmp.ne.s32.totalorder %s725_s1, %s5455_s30  ;;  %p5464_p10 = scmp.lt.s32.totalorder %s5455_s30, %s5455_s30 }
  0x77   : > { %p5458_p7 = pnand %p5456_p4, %p5961_p8  ;;  %p5465_p1 = por %p5464_p10, %p5463_p5 }
  0x79   : > { %p5459_p9 = pneg %p5458_p7 }
  0x7b   : > { %p5466_p3 = pnand %p5465_p1, %p5459_p9 }
  0x7d   : > { %5469 = shalt.err (!%p5466_p3)
}
  0x7e   : > { %5044 = dma.hbm_to_vmem [thread:$0]  (!%p5945_p6), %s6662_s11, 1024, %s725_s1, [#allocation12], %s6619_s24, %s6619_s24, %s6621_s25  }
  0x7f   : > { %s5752_s16 = smov [#allocation14]   ;;  %s5753_s19 = smov [#allocation10]  }
  0x80   : > { %s762_s18 = sshll.u32 %s5752_s16, 4  ;;  %s705_s26 = sshll.u32 %s5753_s19, 4  ;;  %s763_s18 = int_to_ptr.vmem [resolvable:$true] %s762_s18  ;;  %s706_s26 = int_to_ptr.vmem [resolvable:$true] %s705_s26 }
  0x81   : > { %s6663_s17 = sld [smem:[#allocation44_spill]] }
  0x87   : > { %s5470_s5 = scalar_lea.hbm %s6663_s17, 5120 }
  0x88   : > { %p5471_p1 = scmp.ne.s32.totalorder %s6663_s17, %s5470_s5  ;;  %p5477_p12 = scmp.lt.u32.totalorder %s5470_s5, %s6663_s17 }
  0x8a   : > { %p5473_p3 = pnand %p5471_p1, %p5961_p8 }
  0x8c   : > { %p5474_p11 = pneg %p5473_p3 }
  0x8e   : > { %p5479_p13 = pnand %p5477_p12, %p5474_p11 }
  0x90   : > { %5482 = shalt.err (!%p5479_p13)
}
  0x91   : > { %s5483_s1 = scalar_lea.vmem %s763_s18, 5120  ;;  %p5491_p7 = scmp.lt.s32.totalorder %s763_s18, %s763_s18 }
  0x92   : > { %p5484_p0 = scmp.ne.s32.totalorder %s763_s18, %s5483_s1  ;;  %p5492_p9 = scmp.lt.s32.totalorder %s5483_s1, %s5483_s1 }
  0x94   : > { %p5486_p2 = pnand %p5484_p0, %p5961_p8  ;;  %p5493_p5 = por %p5492_p9, %p5491_p7 }
  0x96   : > { %p5487_p4 = pneg %p5486_p2 }
  0x98   : > { %p5494_p10 = pnand %p5493_p5, %p5487_p4 }
  0x9a   : > { %5497 = shalt.err (!%p5494_p10)
}
  0x9b   : > { %5050 = dma.hbm_to_vmem [thread:$0]  (!%p5945_p6), %s6663_s17, 5120, %s763_s18, [#allocation15], %s6619_s24, %s6619_s24, %s6621_s25  }
  0x9c   : > { %s6664_s28 = sld [smem:[#allocation37_spill]] }
  0xa2   : > { %s6665_s9 = smov %s6664_s28  ;;  %s5498_s5 = scalar_lea.hbm %s6664_s28, 3072 }
  0xa3   : > { %p5499_p1 = scmp.ne.s32.totalorder %s6665_s9, %s5498_s5  ;;  %p5505_p12 = scmp.lt.u32.totalorder %s5498_s5, %s6665_s9 }
  0xa5   : > { %p5501_p3 = pnand %p5499_p1, %p5961_p8 }
  0xa7   : > { %p5502_p11 = pneg %p5501_p3 }
  0xa9   : > { %p5507_p13 = pnand %p5505_p12, %p5502_p11 }
  0xab   : > { %5510 = shalt.err (!%p5507_p13)
}
  0xac   : > { %s5511_s6 = scalar_lea.vmem %s706_s26, 3072  ;;  %p5519_p7 = scmp.lt.s32.totalorder %s706_s26, %s706_s26 }
  0xad   : > { %p5512_p0 = scmp.ne.s32.totalorder %s706_s26, %s5511_s6  ;;  %p5520_p9 = scmp.lt.s32.totalorder %s5511_s6, %s5511_s6 }
  0xaf   : > { %p5514_p2 = pnand %p5512_p0, %p5961_p8  ;;  %p5521_p5 = por %p5520_p9, %p5519_p7 }
  0xb1   : > { %p5515_p4 = pneg %p5514_p2 }
  0xb3   : > { %p5522_p10 = pnand %p5521_p5, %p5515_p4 }
  0xb5   : > { %5525 = shalt.err (!%p5522_p10)
}
  0xb6   : > { %5041 = dma.hbm_to_vmem [thread:$0]  (!%p5945_p6), %s6665_s9, 3072, %s706_s26, [#allocation9], %s6619_s24, %s6619_s24, %s6621_s25  }
  0xb7   : > { %s5754_s16 = smov [#allocation13]   ;;  %s5755_s28 = smov [#allocation16]  }
  0xb8   : > { %s743_s19 = sshll.u32 %s5754_s16, 4  ;;  %s781_s5 = sshll.u32 %s5755_s28, 4  ;;  %s744_s19 = int_to_ptr.vmem [resolvable:$true] %s743_s19  ;;  %s782_s5 = int_to_ptr.vmem [resolvable:$true] %s781_s5 }
  0xb9   : > { %s6666_s14 = sld [smem:[#allocation41_spill]] }
  0xbf   : > { %s5526_s10 = scalar_lea.hbm %s6666_s14, 5120 }
  0xc0   : > { %p5527_p1 = scmp.ne.s32.totalorder %s6666_s14, %s5526_s10  ;;  %p5533_p12 = scmp.lt.u32.totalorder %s5526_s10, %s6666_s14 }
  0xc2   : > { %p5529_p3 = pnand %p5527_p1, %p5961_p8 }
  0xc4   : > { %p5530_p11 = pneg %p5529_p3 }
  0xc6   : > { %p5535_p13 = pnand %p5533_p12, %p5530_p11 }
  0xc8   : > { %5538 = shalt.err (!%p5535_p13)
}
  0xc9   : > { %s5539_s26 = scalar_lea.vmem %s744_s19, 5120  ;;  %p5547_p7 = scmp.lt.s32.totalorder %s744_s19, %s744_s19 }
  0xca   : > { %p5540_p0 = scmp.ne.s32.totalorder %s744_s19, %s5539_s26  ;;  %p5548_p9 = scmp.lt.s32.totalorder %s5539_s26, %s5539_s26 }
  0xcc   : > { %p5542_p2 = pnand %p5540_p0, %p5961_p8  ;;  %p5549_p5 = por %p5548_p9, %p5547_p7 }
  0xce   : > { %p5543_p4 = pneg %p5542_p2 }
  0xd0   : > { %p5550_p10 = pnand %p5549_p5, %p5543_p4 }
  0xd2   : > { %5553 = shalt.err (!%p5550_p10)
}
  0xd3   : > { %5047 = dma.hbm_to_vmem [thread:$0]  (!%p5945_p6), %s6666_s14, 5120, %s744_s19, [#allocation12], %s6619_s24, %s6619_s24, %s6621_s25  }
  0xd4   : > { %s6667_s20 = sld [smem:[#allocation47_spill]] }
  0xda   : > { %s5554_s21 = scalar_lea.hbm %s6667_s20, 5120 }
  0xdb   : > { %p5555_p1 = scmp.ne.s32.totalorder %s6667_s20, %s5554_s21  ;;  %p5561_p12 = scmp.lt.u32.totalorder %s5554_s21, %s6667_s20 }
  0xdd   : > { %p5557_p3 = pnand %p5555_p1, %p5961_p8 }
  0xdf   : > { %p5558_p11 = pneg %p5557_p3 }
  0xe1   : > { %p5563_p13 = pnand %p5561_p12, %p5558_p11 }
  0xe3   : > { %5566 = shalt.err (!%p5563_p13)
}
  0xe4   : > { %s5567_s18 = scalar_lea.vmem %s782_s5, 5120  ;;  %p5575_p7 = scmp.lt.s32.totalorder %s782_s5, %s782_s5 }
  0xe5   : > { %p5568_p0 = scmp.ne.s32.totalorder %s782_s5, %s5567_s18  ;;  %p5576_p9 = scmp.lt.s32.totalorder %s5567_s18, %s5567_s18 }
  0xe7   : > { %p5570_p2 = pnand %p5568_p0, %p5961_p8  ;;  %p5577_p5 = por %p5576_p9, %p5575_p7 }
  0xe9   : > { %p5571_p4 = pneg %p5570_p2 }
  0xeb   : > { %p5578_p10 = pnand %p5577_p5, %p5571_p4 }
  0xed   : > { %5581 = shalt.err (!%p5578_p10)
}
  0xee   : > { %5053 = dma.hbm_to_vmem [thread:$0]  (!%p5945_p6), %s6667_s20, 5120, %s782_s5, [#allocation15], %s6619_s24, %s6619_s24, %s6621_s25  }
  0xef   : > { %s4253_s23 = sadd.s32 4294967294, %s5745_s4   ;;  %s60_s2 = sadd.s32 1, %s5741_s8 }
  0xf0   : > { %s69_s11 = sadd.s32 1, %s5733_s7  ;;  %p62_p8 = scmp.ge.s32.totalorder %s60_s2, 2 }
  0xf1   : > { %p76_p1 = scmp.ne.s32.totalorder %s5733_s7, %s5729_s3  ;;  %p77_p3 = scmp.eq.s32.totalorder %s5745_s4, 0 }
  0xf2   : > { %p82_p11 = scmp.ne.s32.totalorder %s5729_s3, %s5725_s27  ;;  %s6718_s2 = smov (%p62_p8, %s60_s2), 0 }
  0xf3   : > { %6668 = sst [smem:[#allocation27_spill]] %s6718_s2  ;;  %p6127_p12 = por %p77_p3, %p76_p1 }
  0xf4   : > { %p6670_p13 = scmp.eq.s32.totalorder %s5929_s29, 0  ;;  %s64_s16 = ssub.s32 %s5741_s8, %s6718_s2 }
  0xf5   : > { %p642_p0 = scmp.eq.s32.totalorder %s5929_s29, 1  ;;  %p67_p2 = scmp.eq.s32.totalorder %s64_s16, 0 }
  0xf6   : > { %p6133_p6 = por %p6670_p13, %p82_p11  ;;  %p648_p4 = scmp.eq.s32.totalorder %s4253_s23, 1 }
  0xf7   : > { %p6140_p7 = por %p642_p0, %p76_p1  ;;  %p5072_p9 = scmp.lt.s32.totalorder %s5745_s4, 2 }
  0xf8   : > { %s6146_s21 = scalar_select %p67_p2, %s5733_s7, %s69_s11  }
  0xf9   : > { %s6672_s28 = scalar_select %p6140_p7, 1, 0 }
  0xfa   : > { %6673 = sst [smem:[#allocation28_spill]] %s6146_s21  ;;  %p6148_p5 = por %p648_p4, %p82_p11 }
  0xfb   : > { %s810_s10 = sand.u32 1, %s5733_s7   ;;  %s4519_s6 = sshll.u32 %s5741_s8, 8 }
  0xfc   : > { %s6674_s30 = scalar_select %p6148_p5, 1, 0 }
  0xfd   : > { %s6153_s1 = sshll.u32 %s810_s10, 3  ;;  %s6675_s26 = sld [smem:[#allocation29_spill]] }
  0xfe   : > { %s814_s16 = scalar_lea.vmem [#allocation2], %s6153_s1  ;;  %p6166_p10 = pnand %p5072_p9, %p6127_p12 }
  0xff   : > { %s823_s11 = sshll.u32 %s814_s16, 4  ;;  %s6677_s14 = sld [smem:[#allocation30_spill]]  ;;  %s6162_s11 = int_to_ptr.vmem [resolvable:$true] %s823_s11 }
 0x100   : > { %s6178_s17 = scalar_lea.sflag [#allocation3], %s810_s10  ;;  %p5584_p1 = pneg %p6166_p10 }
 0x103   : > { %s6159_s23 = scalar_lea.hbm %s6675_s26, %s4519_s6  ;;  %s5587_s25 = scalar_lea.hbm %s6675_s26, 512 }
 0x104   : > { %s5582_s16 = scalar_lea.hbm %s6159_s23, 128  ;;  %p5588_p12 = scmp.lt.u32.totalorder %s6159_s23, %s6675_s26 }
 0x105   : > { %s6173_s18 = scalar_lea.hbm %s6677_s14, %s4519_s6  ;;  %p5583_p8 = scmp.ne.s32.totalorder %s6159_s23, %s5582_s16 }
 0x106   : > { %s6176_s19 = scalar_lea.hbm %s6173_s18, 128  ;;  %p5589_p13 = scmp.lt.u32.totalorder %s5587_s25, %s5582_s16 }
 0x107   : > { %p5585_p3 = pnand %p5584_p1, %p5583_p8  ;;  %p5591_p2 = scmp.lt.u32.totalorder %s5582_s16, %s6159_s23 }
 0x108   : > { %p5590_p0 = por %p5589_p13, %p5588_p12 }
 0x109   : > { %p5586_p11 = pneg %p5585_p3 }
 0x10a   : > { %p5592_p4 = por %p5591_p2, %p5590_p0 }
 0x10c   : > { %p5593_p9 = pnand %p5592_p4, %p5586_p11 }
 0x10e   : > { %5596 = shalt.err (!%p5593_p9)
}
 0x10f   : > { %s5597_s10 = scalar_lea.vmem %s6162_s11, 128  ;;  %s5756_s20 = smov [#allocation2]  }
 0x110   : > { %p5598_p8 = scmp.ne.s32.totalorder %s6162_s11, %s5597_s10  ;;  %s5602_s15 = sshll.u32 %s5756_s20, 4  ;;  %s5603_s15 = int_to_ptr.vmem [resolvable:$false] %s5602_s15 }
 0x111   : > { %s5604_s9 = scalar_lea.vmem %s5603_s15, 256  ;;  %p5605_p7 = scmp.lt.s32.totalorder %s6162_s11, %s5603_s15 }
 0x112   : > { %p5600_p3 = pnand %p5598_p8, %p5584_p1  ;;  %p5606_p12 = scmp.lt.s32.totalorder %s5604_s9, %s5597_s10 }
 0x114   : > { %p5601_p5 = pneg %p5600_p3  ;;  %p5607_p13 = por %p5606_p12, %p5605_p7 }
 0x116   : > { %p5608_p0 = pnand %p5607_p13, %p5601_p5 }
 0x118   : > { %5611 = shalt.err (!%p5608_p0)
}
 0x119   : > { %s6678_s16 = smov 4   ;;  %s6679_s25 = smov 64  }
 0x11a   : > { %5057 = dma.hbm_to_vmem [thread:$0]  (!%p6166_p10), %s6159_s23, 128, %s6162_s11, %s6178_s17, %s6679_s25, %s6679_s25, %s6678_s16  }
 0x11b   : > { %s837_s6 = scalar_lea.vmem [#allocation5], %s6153_s1  ;;  %s833_s20 = sand.u32 1, %s5745_s4  }
 0x11c   : > { %s847_s10 = sshll.u32 %s837_s6, 4  ;;  %s6213_s15 = scalar_lea.sflag [#allocation6], %s833_s20  ;;  %s6211_s10 = int_to_ptr.vmem [resolvable:$true] %s847_s10 }
 0x11d   : > { %s5642_s9 = scalar_lea.hbm %s6173_s18, 256  ;;  %s5617_s2 = scalar_lea.hbm %s6677_s14, 512 }
 0x11e   : > { %p5613_p7 = scmp.ne.s32.totalorder %s6176_s19, %s5642_s9  ;;  %p5618_p2 = scmp.lt.u32.totalorder %s6176_s19, %s6677_s14 }
 0x11f   : > { %p5619_p4 = scmp.lt.u32.totalorder %s5617_s2, %s5642_s9  ;;  %p5621_p8 = scmp.lt.u32.totalorder %s5642_s9, %s6176_s19 }
 0x120   : > { %p5615_p5 = pnand %p5613_p7, %p5584_p1 }
 0x121   : > { %p5620_p9 = por %p5619_p4, %p5618_p2 }
 0x122   : > { %p5616_p11 = pneg %p5615_p5 }
 0x123   : > { %p5622_p3 = por %p5621_p8, %p5620_p9 }
 0x125   : > { %p5623_p12 = pnand %p5622_p3, %p5616_p11 }
 0x127   : > { %5626 = shalt.err (!%p5623_p12)
}
 0x128   : > { %s5627_s17 = scalar_lea.vmem %s6211_s10, 128  ;;  %s5757_s22 = smov [#allocation5]  }
 0x129   : > { %p5628_p13 = scmp.ne.s32.totalorder %s6211_s10, %s5627_s17  ;;  %s5632_s1 = sshll.u32 %s5757_s22, 4  ;;  %s5633_s1 = int_to_ptr.vmem [resolvable:$false] %s5632_s1 }
 0x12a   : > { %s5634_s8 = scalar_lea.vmem %s5633_s1, 256  ;;  %p5635_p5 = scmp.lt.s32.totalorder %s6211_s10, %s5633_s1 }
 0x12b   : > { %p5630_p0 = pnand %p5628_p13, %p5584_p1  ;;  %p5636_p2 = scmp.lt.s32.totalorder %s5634_s8, %s5627_s17 }
 0x12d   : > { %p5631_p7 = pneg %p5630_p0  ;;  %p5637_p4 = por %p5636_p2, %p5635_p5 }
 0x12f   : > { %p5638_p9 = pnand %p5637_p4, %p5631_p7 }
 0x131   : > { %5641 = shalt.err (!%p5638_p9)
}
 0x132   : > { %5060 = dma.hbm_to_vmem [thread:$0]  (!%p6166_p10), %s6176_s19, 128, %s6211_s10, %s6213_s15, %s6679_s25, %s6679_s25, %s6678_s16  }
 0x133   : > { %p6680_p1 = scmp.ne.s32.totalorder %s6656_s0, 0 }
 0x134   : > { %s6245_s2 = sand.u32 (!%p6680_p1), 1, %s5729_s3  }
 0x135   : > { %859 = sbr.rel (%p6680_p1) target bundleno = 1774 (0x6ee), region = 124  ;;  %s4270_s21 = sshll.u32 (!%p6680_p1), %s6245_s2, 3 }
 0x136   : > { %s862_s26 = scalar_lea.sflag (!%p6680_p1), [#allocation3], %s6245_s2  ;;  %s6249_s23 = scalar_lea.vmem (!%p6680_p1), [#allocation2], %s4270_s21 }
 0x13c   : > { %5696 = dma.done.wait (%p6133_p6), %s862_s26, 128  }
 0x13d   : > { %5698 = vsyncadd (%p6133_p6), %s862_s26, 4294967168  ;;  %s870_s24 = sand.u32 1, %s5929_s29   ;;  %s6256_s11 = scalar_lea.vmem [#allocation5], %s4270_s21 }
 0x13e   : > { %s871_s0 = scalar_lea.sflag [#allocation6], %s870_s24 }
 0x13f   : > { %5700 = dma.done.wait (%p6133_p6), %s871_s0, 128  }
 0x140   : > { %5702 = vsyncadd (%p6133_p6), %s871_s0, 4294967168  ;;  %p6681_p10 = scmp.eq.s32.totalorder %s5929_s29, 0 }
 0x142   : > { %5704 = dma.done.wait (%p6681_p10), [#allocation6], 3072   ;;  %p6682_p11 = pmov %p6681_p10 }
 0x143   : > { %p6683_p8 = pmov %p6681_p10 }
 0x144   : > { %5706 = vsyncadd (%p6682_p11), [#allocation6], 4294964224 }
 0x145   : > { %5708 = dma.done.wait (%p6683_p8), [#allocation9], 6144   ;;  %p6684_p3 = pmov %p6683_p8 }
 0x147   : > { %5710 = vsyncadd (%p6684_p3), [#allocation9], 4294961152  ;;  %p6685_p12 = pmov %p6684_p3 }
 0x148   : > { %p6686_p13 = pmov %p6684_p3 }
 0x149   : > { %5712 = dma.done.wait (%p6685_p12), [#allocation12], 6144  }
 0x14a   : > { %5714 = vsyncadd (%p6686_p13), [#allocation12], 4294961152  ;;  %p6687_p6 = pmov %p6684_p3 }
 0x14b   : > { %p6688_p0 = pmov %p6684_p3 }
 0x14c   : > { %5716 = dma.done.wait (%p6687_p6), [#allocation15], 10240  }
 0x14d   : > { %5718 = vsyncadd (%p6688_p0), [#allocation15], 4294957056  ;;  %v5142_v0 = vld [vmem:[#allocation7 + $0x40] sm:$0xff]   ;;  %v5145_v3 = vld [vmem:[#allocation7 + $0x48] sm:$0xff]   ;;  %vm1069_vm0 = vsmask.f32 7424 }
 0x14e   : > { %v5143_v1 = vld [vmem:[#allocation7] sm:$0xff]   ;;  %4528 = vmatprep.subr.bf16.mxu0 %v5142_v0  ;;  %v5146_v4 = vld [vmem:[#allocation7 + $0x8] sm:$0xff]   ;;  %v5148_v6 = vld [vmem:[#allocation7 + $0x50] sm:$0xff]   ;;  %vm1085_vm1 = vcmask 1046528   ;;  %vm1089_vm2 = vsmask.f32 6400 }
 0x14f   : > { %v5144_v2 = vld [vmem:[#allocation7 + $0x80] sm:$0xff]   ;;  %4529 = vmatpush3.bf16.msra.mxu0 %v5143_v1  ;;  %v5147_v5 = vld [vmem:[#allocation7 + $0x88] sm:$0xff]   ;;  %v5149_v7 = vld [vmem:[#allocation7 + $0x10] sm:$0xff]   ;;  %s6689_s18 = sld [smem:[#allocation32_spill]]  ;;  %s6690_s25 = sld [smem:[#allocation33_spill]]  ;;  %vm1409_vm4 = vcmask 1043456  }
 0x150   : > { %4838 = vmatprep.subr.bf16.mxu1 %v5144_v2  ;;  %4530 = vmatprep.subr.bf16.mxu0 %v5145_v3  ;;  %v5150_v8 = vld [vmem:[#allocation7 + $0x90] sm:$0xff]   ;;  %v5151_v9 = vld [vmem:[#allocation7 + $0x58] sm:$0xff]   ;;  %v5154_v12 = vld [vmem:[#allocation7 + $0x60] sm:$0xff]   ;;  %vm1491_vm6 = vcmask 1045504   ;;  %vm1773_vm7 = vcmask 1044480   ;;  %vm5759_vm8 = vmmov 0  }
 0x151   : > { %4839 = vmatpush3.bf16.msra.mxu1 %v5144_v2  ;;  %v5152_v10 = vld [vmem:[#allocation7 + $0x18] sm:$0xff]   ;;  %v5156_v13 = vld [vmem:[#allocation7 + $0xa0] sm:$0xff]   ;;  %v5157_v15 = vld [vmem:[#allocation7 + $0x68] sm:$0xff]   ;;  %s6691_s20 = sld [smem:[#allocation35_spill]]  ;;  %s6692_s17 = sld [smem:[#allocation36_spill]]  ;;  %vm2298_vm10 = vcmask 1040384  }
 0x152   : > { %4840 = vmatprep.subr.bf16.mxu1 %v5147_v5  ;;  %v5153_v11 = vld [vmem:[#allocation7 + $0x98] sm:$0xff]   ;;  %v5155_v14 = vld [vmem:[#allocation7 + $0x20] sm:$0xff]   ;;  %v5159_v16 = vld [vmem:[#allocation7 + $0xa8] sm:$0xff]   ;;  %vm1855_vm9 = vsmask.f32 5376  ;;  %s6693_s8 = sld [smem:[#allocation38_spill]] }
 0x153   : > { %4531 = vmatpush3.bf16.msra.mxu0 %v5146_v4  ;;  %v5158_v17 = vld [vmem:[#allocation7 + $0x28] sm:$0xff]   ;;  %v5160_v18 = vld [vmem:[#allocation7 + $0x70] sm:$0xff]   ;;  %v5163_v21 = vld [vmem:[#allocation7 + $0x78] sm:$0xff]   ;;  %s6694_s0 = sld [smem:[#allocation39_spill]]  ;;  %vm2299_vm11 = vcmask 1044484   ;;  %s4279_s5 = sshll.u32 %s6245_s2, 4 }
 0x154   : > { %4532 = vmatprep.subr.bf16.mxu0 %v5148_v6  ;;  %v5161_v19 = vld [vmem:[#allocation7 + $0x30] sm:$0xff]   ;;  %v5165_v22 = vld [vmem:[#allocation7 + $0xb8] sm:$0xff]   ;;  %v5166_v24 = vld [vmem:[%s6249_s23] sm:$0xff]   ;;  %vm2813_vm13 = vcmask 1041408   ;;  %s6703_s24 = sld [smem:[#allocation48_spill]]  ;;  %s6704_s29 = sld [smem:[#allocation52_spill]] }
 0x155   : > { %4841 = vmatpush3.bf16.msra.mxu1 %v5147_v5  ;;  %v5162_v20 = vld [vmem:[#allocation7 + $0xb0] sm:$0xff]   ;;  %v5164_v23 = vld [vmem:[#allocation7 + $0x38] sm:$0xff]   ;;  %v1071_v26 = vshrl.u32 %v5166_v24, 16  ;;  %v1073_v27 = vshll.u32 %v5166_v24, 16  ;;  %v1086_v30 = vrot.slane %v5166_v24, 1  ;;  %v5168_v3 = vld [vmem:[#allocation8 + $0x80] sm:$0xff]  }
 0x156   : > { %4842 = vmatprep.subr.bf16.mxu1 %v5150_v8  ;;  %v5167_v25 = vld [vmem:[%s6256_s11] sm:$0xff]   ;;  %v5169_v4 = vld [vmem:[#allocation8 + $0x40] sm:$0xff]   ;;  %v5171_v6 = vld [vmem:[#allocation8 + $0x88] sm:$0xff]   ;;  %s6705_s16 = sld [smem:[#allocation49_spill]]  ;;  %s6707_s9 = sld [smem:[#allocation53_spill]] }
 0x157   : > { %4533 = vmatpush3.bf16.msra.mxu0 %v5149_v7  ;;  %v1078_v28 = vshll.u32 %v5167_v25, 16  ;;  %v1082_v29 = vshrl.u32 %v5167_v25, 16  ;;  %v6280_v31 = vrot.slane %v5167_v25, 1  ;;  %v1075_v32 = vrot.slane %v1073_v27, 1  ;;  %v5170_v5 = vld [vmem:[#allocation8] sm:$0xff]   ;;  %v5172_v7 = vld [vmem:[#allocation8 + $0x48] sm:$0xff]   ;;  %vm6403_vm12 = vmor %vm2298_vm10, %vm2299_vm11 }
 0x158   : > { %4534 = vmatprep.subr.bf16.mxu0 %v5151_v9  ;;  %v1090_v34 = vrot.slane %v1071_v26, 1  ;;  %v1091_v35 = vrot.slane %v1073_v27, 2  ;;  %v5174_v9 = vld [vmem:[#allocation8 + $0x90] sm:$0xff]   ;;  %v5189_v24 = vld [vmem:[#allocation8 + $0xb8] sm:$0xff]   ;;  %s4056_s22 = scalar_lea.sflag [#allocation4], %s6245_s2  ;;  %p6708_p5 = scmp.ne.s32.totalorder %s6672_s28, 0 }
 0x159   : > { %4843 = vmatpush3.bf16.msra.mxu1 %v5150_v8  ;;  %v1080_v33 = vrot.slane %v1078_v28, 1  ;;  %v1093_v36 = vrot.slane %v1082_v29, 1  ;;  %v6284_v37 = vsel %vm1085_vm1, %v1086_v30, %v6280_v31  ;;  %v1123_v38 = vshrl.u32 %v6280_v31, 16  ;;  %v5173_v8 = vld [vmem:[#allocation8 + $0x8] sm:$0xff]   ;;  %v5190_v25 = vld [vmem:[#allocation8 + $0x78] sm:$0xff]  }
 0x15a   : > { %4844 = vmatprep.subr.bf16.mxu1 %v5153_v11  ;;  %v1076_v39 = vor.u32 %v1075_v32, %v1071_v26  ;;  %v1094_v41 = vrot.slane %v1078_v28, 2  ;;  %v1115_v42 = vshrl.u32 %v6284_v37, 16  ;;  %v1118_v43 = vshll.u32 %v6284_v37, 16  ;;  %v5191_v26 = vld [vmem:[#allocation8 + $0x38] sm:$0xff]  }
 0x15b   : > { %4535 = vmatpush3.bf16.msra.mxu0 %v5152_v10  ;;  %v6287_v40 = vor.u32 %v1082_v29, %v1080_v33  ;;  %v1125_v44 = vrot.slane %v1123_v38, 1  ;;  %v1126_v45 = vshll.u32 %v6280_v31, 16  ;;  %v1092_v52 = vor.u32 %v1091_v35, %v1090_v34  ;;  %v5175_v10 = vld [vmem:[#allocation8 + $0x50] sm:$0xff]   ;;  %v4306_v38 = vld [vmem:[%s6689_s18] ss:$0 sm:$0xff]  ;;  %s6409_s18 = scalar_lea.vmem [#allocation17], %s4279_s5 }
 0x15c   : > { %4536 = vmatprep.subr.bf16.mxu0 %v5154_v12  ;;  %v6293_v46 = vsel %vm1069_vm0, %v1076_v39, %v1080_v33  ;;  %v1117_v49 = vrot.slane %v1115_v42, 1  ;;  %v1120_v53 = vrot.slane %v1118_v43, 2  ;;  %v6299_v56 = vor.u32 %v1094_v41, %v1093_v36  ;;  %v5177_v12 = vld [vmem:[#allocation8 + $0x98] sm:$0xff]   ;;  %v4307_v42 = vld [vmem:[%s6690_s25] ss:$0 sm:$0xff]  ;;  %s6697_s25 = sld [smem:[#allocation42_spill]] }
 0x15d   : > { %4845 = vmatpush3.bf16.msra.mxu1 %v5153_v11  ;;  %v1106_v47 = vshrl.u32 %v6287_v40, 16  ;;  %v1109_v48 = vshll.u32 %v6287_v40, 16  ;;  %v1098_v50 = vshrl.u32 %v6293_v46, 16  ;;  %v1101_v51 = vshll.u32 %v6293_v46, 16  ;;  %v5176_v11 = vld [vmem:[#allocation8 + $0x10] sm:$0xff]   ;;  %s4072_s10 = sshll.u32 %s6409_s18, 4  ;;  %s6529_s10 = int_to_ptr.vmem [resolvable:$true] %s4072_s10 }
 0x15e   : > { %4846 = vmatprep.subr.bf16.mxu1 %v5156_v13  ;;  %v1128_v57 = vrot.slane %v1126_v45, 2  ;;  %v1121_v60 = vor.u32 %v1120_v53, %v1117_v49  ;;  %v6303_v0 = vsel %vm1089_vm2, %v1092_v52, %v6299_v56  ;;  %s5643_s1 = scalar_lea.vmem %s6529_s10, 256 }
 0x15f   : > { %4537 = vmatpush3.bf16.msra.mxu0 %v5155_v14  ;;  %v1108_v54 = vrot.slane %v1106_v47, 1  ;;  %v1111_v55 = vrot.slane %v1109_v48, 2  ;;  %v1100_v58 = vrot.slane %v1098_v50, 1  ;;  %v1103_v59 = vrot.slane %v1101_v51, 2  ;;  %v5179_v14 = vld [vmem:[#allocation8 + $0x18] sm:$0xff]   ;;  %p5644_p7 = scmp.ne.s32.totalorder %s6529_s10, %s5643_s1 }
 0x160   : > { %4538 = vmatprep.subr.bf16.mxu0 %v5157_v15  ;;  %v1129_v62 = vor.u32 %v1128_v57, %v1125_v44  ;;  %v5180_v15 = vld [vmem:[#allocation8 + $0xa0] sm:$0xff]   ;;  %v999_v50 = vlaneseq }
 0x161   : > { %4847 = vmatpush3.bf16.msra.mxu1 %v5156_v13  ;;  %v1112_v61 = vor.u32 %v1111_v55, %v1108_v54  ;;  %v1104_v63 = vor.u32 %v1103_v59, %v1100_v58  ;;  %v5178_v13 = vld [vmem:[#allocation8 + $0x58] sm:$0xff]   ;;  %p5645_p2 = pnand %p5644_p7, %p6708_p5 }
 0x162   : > { %4848 = vmatprep.subr.bf16.mxu1 %v5159_v16  ;;  %v1130_v1 = vsel %vm1089_vm2, %v1121_v60, %v1129_v62  ;;  %v1000_v57 = vshrl.u32 %v999_v50, 7  ;;  %v5201_v50 = vld [vmem:[#allocation10 + $0x98] sm:$0xff]  }
 0x163   : > { %4539 = vmatpush3.bf16.msra.mxu0 %v5158_v17  ;;  %v1113_v2 = vsel %vm1089_vm2, %v1104_v63, %v1112_v61  ;;  %4854 = vmatprep.mubr.bf16.mxu1 %v1130_v1  ;;  %v5182_v17 = vld [vmem:[#allocation8 + $0x20] sm:$0xff]   ;;  %p5646_p4 = pneg %p5645_p2 }
 0x164   : > { %4540 = vmatprep.subr.bf16.mxu0 %v5160_v18  ;;  %1313 = vmatprep.mubr.bf16.mxu0 %v1113_v2  ;;  %v5183_v18 = vld [vmem:[#allocation8 + $0xa8] sm:$0xff]   ;;  %v6315_v60 = vadd.s32 4294967290, %v1000_v57 }
 0x165   : > { %4849 = vmatpush3.bf16.msra.mxu1 %v5159_v16  ;;  %v5181_v16 = vld [vmem:[#allocation8 + $0x60] sm:$0xff]  }
 0x166   : > { %4850 = vmatprep.subr.bf16.mxu1 %v5162_v20  ;;  %vm1009_vm3 = vcmp.ge.s32.totalorder %v6315_v60, 0 }
 0x167   : > { %4541 = vmatpush3.bf16.msra.mxu0 %v5161_v19  ;;  %v5184_v19 = vld [vmem:[#allocation8 + $0x68] sm:$0xff]  }
 0x168   : > { %4542 = vmatprep.subr.bf16.mxu0 %v5163_v21  ;;  %v5186_v21 = vld [vmem:[#allocation8 + $0xb0] sm:$0xff]  }
 0x169   : > { %4851 = vmatpush3.bf16.msra.mxu1 %v5162_v20  ;;  %v5185_v20 = vld [vmem:[#allocation8 + $0x28] sm:$0xff]  }
 0x16a   : > { %4852 = vmatprep.subr.bf16.mxu1 %v5165_v22 }
 0x16b   : > { %4543 = vmatpush3.bf16.msra.mxu0 %v5164_v23  ;;  %v5188_v23 = vld [vmem:[#allocation8 + $0x30] sm:$0xff]  }
 0x16c   : > { %4566 = vmatprep.subr.bf16.mxu0 %v5169_v4 }
 0x16d   : > { %4853 = vmatpush3.bf16.msra.mxu1 %v5165_v22  ;;  %v5187_v22 = vld [vmem:[#allocation8 + $0x70] sm:$0xff]  }
 0x16e   : > { %1314 = vmatmul.mubr.bf16.vlgmr.msra.gmra.mrb[0].mxu0 %v6303_v0  ;;  %4858 = vmatprep.subr.bf16.mxu1 %v5168_v3 }
 0x16f   : > { %1321 = vmatprep.mubr.bf16.mxu0 %v1112_v61  ;;  %4567 = vmatpush3.bf16.msra.mxu0 %v5170_v5 }
 0x170   : > { %4855 = vmatmul.mubr.bf16.vlgmr.msra.gmra.mrb[0].mxu1 %v1129_v62  ;;  %4568 = vmatprep.subr.bf16.mxu0 %v5172_v7  ;;  %v1002_v62 = vadd.s32 16, %v1000_v57  ;;  %v5207_v57 = vld [vmem:[#allocation10 + $0xa8] sm:$0xff]  }
 0x171   : > { %4859 = vmatpush3.bf16.msra.mxu1 %v5168_v3 }
 0x172   : > { %4860 = vmatprep.subr.bf16.mxu1 %v5171_v6  ;;  %v6318_v3 = vadd.s32 4294967290, %v1002_v62  ;;  %v5211_v62 = vld [vmem:[#allocation10 + $0x70] sm:$0xff]  }
 0x173   : > { %4569 = vmatpush3.bf16.msra.mxu0 %v5173_v8 }
 0x174   : > { %4570 = vmatprep.subr.bf16.mxu0 %v5175_v10  ;;  %vm1015_vm5 = vcmp.lt.s32.totalorder %v6318_v3, 16 }
 0x175   : > { %4861 = vmatpush3.bf16.msra.mxu1 %v5171_v6 }
 0x176   : > { %1322 = vmatmul.mubr.bf16.gmra.mrb[4].mxu0 %v6299_v56  ;;  %4862 = vmatprep.subr.bf16.mxu1 %v5174_v9 }
 0x177   : > { %4571 = vmatpush3.bf16.msra.mxu0 %v5176_v11 }
 0x178   : > { %4572 = vmatprep.subr.bf16.mxu0 %v5178_v13 }
 0x179   : > { %4863 = vmatpush3.bf16.msra.mxu1 %v5174_v9 }
 0x17a   : > { %4864 = vmatprep.subr.bf16.mxu1 %v5177_v12 }
 0x17b   : > { %4573 = vmatpush3.bf16.msra.mxu0 %v5179_v14 }
 0x17c   : > { %4574 = vmatprep.subr.bf16.mxu0 %v5181_v16 }
 0x17d   : > { %4865 = vmatpush3.bf16.msra.mxu1 %v5177_v12 }
 0x17e   : > { %4866 = vmatprep.subr.bf16.mxu1 %v5180_v15 }
 0x17f   : > { %4575 = vmatpush3.bf16.msra.mxu0 %v5182_v17 }
 0x180   : > { %4576 = vmatprep.subr.bf16.mxu0 %v5184_v19 }
 0x181   : > { %4867 = vmatpush3.bf16.msra.mxu1 %v5180_v15 }
 0x182   : > { %4868 = vmatprep.subr.bf16.mxu1 %v5183_v18 }
 0x183   : > { %4577 = vmatpush3.bf16.msra.mxu0 %v5185_v20 }
 0x184   : > { %4578 = vmatprep.subr.bf16.mxu0 %v5187_v22 }
 0x185   : > { %4869 = vmatpush3.bf16.msra.mxu1 %v5183_v18 }
 0x186   : > { %4870 = vmatprep.subr.bf16.mxu1 %v5186_v21 }
 0x187   : > { %4579 = vmatpush3.bf16.msra.mxu0 %v5188_v23 }
 0x188   : > { %4580 = vmatprep.subr.bf16.mxu0 %v5190_v25 }
 0x189   : > { %4871 = vmatpush3.bf16.msra.mxu1 %v5186_v21 }
 0x18a   : > { %4872 = vmatprep.subr.bf16.mxu1 %v5189_v24 }
 0x18b   : > { %4581 = vmatpush3.bf16.msra.mxu0 %v5191_v26 }
 0x18d   : > { %4873 = vmatpush3.bf16.msra.mxu1 %v5189_v24 }
 0x241   : > { %v4544_v28 = vpop.f32.mrb[0].mxu0 }
 0x242   : > { %v4545_v30 = vpop.f32.mrb[1].mxu0 }
 0x243   : > { %v4856_v27 = vpop.f32.mrb[0].mxu1  ;;  %v4546_v33 = vadd.f32 %v4545_v30, %v4544_v28  ;;  %v4547_v34 = vpop.f32.mrb[2].mxu0 }
 0x244   : > { %v1363_v29 = vpop.f32.mrb[1].mxu1  ;;  %v4548_v36 = vpop.f32.mrb[3].mxu0 }
 0x245   : > { %v4857_v32 = vpop.f32.mrb[2].mxu1  ;;  %v4549_v39 = vadd.f32 %v4548_v36, %v4547_v34  ;;  %v1364_v41 = vadd.f32 %v4546_v33, %v1363_v29 }
 0x246   : > { %v1366_v35 = vpop.f32.mrb[3].mxu1 }
 0x247   : > { %v1384_v43 = vmul.f32 %v4306_v38, %v1364_v41  ;;  %v1367_v44 = vadd.f32 %v4549_v39, %v1366_v35  ;;  %v5758_v39 = vmov 0.0   ;;  %v5193_v41 = vld [vmem:[#allocation10 + $0x40] sm:$0xff]  }
 0x248   : > { %4878 = vmatprep.subr.bf16.mxu1 %v5758_v39  ;;  %4604 = vmatprep.subr.bf16.mxu0 %v5193_v41 }
 0x249   : > { %v1394_v45 = vadd.f32 %v4307_v42, %v1384_v43  ;;  %v1385_v47 = vmul.f32 %v4306_v38, %v1367_v44  ;;  %v4550_v48 = vpop.f32.mrb[4].mxu0  ;;  %v5195_v43 = vld [vmem:[#allocation10 + $0x88] sm:$0xff]  }
 0x24a   : > { %v4551_v49 = vpop.f32.mrb[5].mxu0  ;;  %v5196_v44 = vld [vmem:[#allocation10 + $0x48] sm:$0xff]  }
 0x24b   : > { %5352 = vtanh.f32 %v1394_v45  ;;  %v1395_v51 = vadd.f32 %v4307_v42, %v1385_v47  ;;  %v4552_v52 = vadd.f32 %v4551_v49, %v4550_v48  ;;  %v4553_v53 = vpop.f32.mrb[6].mxu0  ;;  %v5197_v45 = vld [vmem:[#allocation10 + $0x8] sm:$0xff]   ;;  %v5198_v47 = vld [vmem:[#allocation10 + $0x90] sm:$0xff]  }
 0x24c   : > { %v4554_v54 = vpop.f32.mrb[7].mxu0  ;;  %v5199_v48 = vld [vmem:[#allocation10 + $0x50] sm:$0xff]   ;;  %v5204_v53 = vld [vmem:[#allocation10 + $0xa0] sm:$0xff]  }
 0x24d   : > { %5354 = vtanh.f32 %v1395_v51  ;;  %v1372_v55 = vadd.f32 %v4856_v27, %v4552_v52  ;;  %v5200_v49 = vld [vmem:[#allocation10 + $0x10] sm:$0xff]   ;;  %v5202_v51 = vld [vmem:[#allocation10 + $0x58] sm:$0xff]   ;;  %v5205_v54 = vld [vmem:[#allocation10 + $0x60] sm:$0xff]  }
 0x24e   : > { %v5203_v52 = vld [vmem:[#allocation10 + $0x18] sm:$0xff]  }
 0x24f   : > { %v1386_v58 = vmul.f32 %v4306_v38, %v1372_v55  ;;  %v5192_v38 = vld [vmem:[#allocation10 + $0x80] sm:$0xff]  }
 0x250   : > { %v5206_v55 = vld [vmem:[#allocation10 + $0x20] sm:$0xff]  }
 0x251   : > { %v1396_v59 = vadd.f32 %v4307_v42, %v1386_v58  ;;  %v5194_v42 = vld [vmem:[#allocation10] sm:$0xff]   ;;  %v5208_v58 = vld [vmem:[#allocation10 + $0x68] sm:$0xff]  }
 0x253   : > { %5356 = vtanh.f32 %v1396_v59  ;;  %v5209_v59 = vld [vmem:[#allocation10 + $0x28] sm:$0xff]  }
 0x255   : > { %v5353_v61 = vpop.eup %5352 }
 0x256   : > { %v1410_v63 = vrot.slane %v5353_v61, 4  ;;  %v5210_v61 = vld [vmem:[#allocation10 + $0xb0] sm:$0xff]  }
 0x257   : > { %v5355_v1 = vpop.eup %5354 }
 0x258   : > { %v1411_v2 = vrot.slane %v5355_v1, 4  ;;  %v1418_v4 = vsel %vm1009_vm3, %v1410_v63, 0.0  ;;  %v5213_v1 = vld [vmem:[#allocation10 + $0xb8] sm:$0xff]  }
 0x25a   : > { %v1412_v5 = vsel %vm1409_vm4, %v1410_v63, %v1411_v2  ;;  %v5212_v63 = vld [vmem:[#allocation10 + $0x30] sm:$0xff]  }
 0x25b   : > { %v1421_v6 = vpack.c.bf16 %v1412_v5, %v1418_v4  ;;  %v5215_v4 = vld [vmem:[#allocation10 + $0x38] sm:$0xff]   ;;  %v5217_v5 = vld [vmem:[#allocation13 + $0x40] sm:$0xff]  }
 0x25d   : > { %v5357_v7 = vpop.eup %5356  ;;  %v1474_v8 = vshll.u32 %v1421_v6, 16  ;;  %v1488_v14 = vrot.slane %v1421_v6, 1  ;;  %v1472_v15 = vshrl.u32 %v1421_v6, 16  ;;  %v1492_v18 = vrot.slane %v1421_v6, 2 }
 0x25e   : > { %v1413_v9 = vrot.slane %v5357_v7, 4  ;;  %v2161_v22 = vrot.slane %v1421_v6, 3 }
 0x25f   : > { %v1476_v12 = vrot.slane %v1474_v8, 1 }
 0x260   : > { %v1414_v10 = vsel %vm1409_vm4, %v1411_v2, %v1413_v9  ;;  %v5214_v2 = vld [vmem:[#allocation10 + $0x78] sm:$0xff]  }
 0x261   : > { %v1420_v11 = vsel %vm1015_vm5, %v1414_v10, 0.0  ;;  %v1477_v20 = vor.u32 %v1476_v12, %v1472_v15 }
 0x262   : > { %v1422_v13 = vpack.c.bf16 %v1420_v11, %v1420_v11 }
 0x264   : > { %v1489_v16 = vrot.slane %v1422_v13, 1  ;;  %v1479_v17 = vshll.u32 %v1422_v13, 16  ;;  %v1493_v19 = vrot.slane %v1422_v13, 2  ;;  %v1483_v21 = vshrl.u32 %v1422_v13, 16 }
 0x265   : > { %v2162_v23 = vrot.slane %v1422_v13, 3 }
 0x266   : > { %v1490_v24 = vsel %vm1085_vm1, %v1488_v14, %v1489_v16  ;;  %v1499_v25 = vrot.slane %v1489_v16, 2  ;;  %v1481_v26 = vrot.slane %v1479_v17, 1  ;;  %v1494_v27 = vsel %vm1491_vm6, %v1492_v18, %v1493_v19  ;;  %v4332_v14 = vld [vmem:[%s6691_s20] ss:$0 sm:$0xff]  ;;  %s6698_s20 = sld [smem:[#allocation43_spill]] }
 0x267   : > { %v1498_v28 = vrot.slane %v1490_v24, 2  ;;  %v6330_v29 = vsel %vm1773_vm7, %v2161_v22, %v2162_v23  ;;  %v4333_v18 = vld [vmem:[%s6692_s17] ss:$0 sm:$0xff]  ;;  %s6699_s17 = sld [smem:[#allocation45_spill]] }
 0x268   : > { %v1482_v30 = vsel %vm1069_vm0, %v1477_v20, %v1481_v26  ;;  %v1485_v32 = vor.u32 %v1483_v21, %v1481_v26 }
 0x269   : > { %v1500_v33 = vsel %vm1491_vm6, %v1498_v28, %v1499_v25  ;;  %v1495_v34 = vrot.slane %v1482_v30, 2 }
 0x26a   : > { %4874 = vmatprep.mubr.bf16.mxu1 %v1500_v33  ;;  %v1496_v35 = vrot.slane %v1485_v32, 2 }
 0x26b   : > { %4875 = vmatmul.mubr.bf16.vlgmr.msra.gmra.mrb[4].mxu1 %v1499_v25 }
 0x26c   : > { %v1497_v36 = vsel %vm1491_vm6, %v1495_v34, %v1496_v35  ;;  %4879 = vmatpush3.bf16.msra.mxu1 %v5192_v38  ;;  %4894 = vmatprep.mubr.msk.bf16.mxu1 %vm5759_vm8, %v5758_v39 }
 0x26d   : > { %1683 = vmatprep.mubr.bf16.mxu0 %v1497_v36  ;;  %4880 = vmatprep.subr.bf16.mxu1 %v5758_v39 }
 0x26e   : > { %1684 = vmatmul.mubr.bf16.vlgmr.msra.gmra.mrb[8].mxu0 %v1494_v27 }
 0x26f   : > { %1691 = vmatprep.mubr.bf16.mxu0 %v1496_v35  ;;  %4605 = vmatpush3.bf16.msra.mxu0 %v5194_v42 }
 0x270   : > { %4881 = vmatpush3.bf16.msra.mxu1 %v5195_v43  ;;  %4606 = vmatprep.subr.bf16.mxu0 %v5196_v44 }
 0x271   : > { %4882 = vmatprep.subr.bf16.mxu1 %v5758_v39 }
 0x273   : > { %4607 = vmatpush3.bf16.msra.mxu0 %v5197_v45 }
 0x274   : > { %4883 = vmatpush3.bf16.msra.mxu1 %v5198_v47  ;;  %4608 = vmatprep.subr.bf16.mxu0 %v5199_v48 }
 0x275   : > { %4884 = vmatprep.subr.bf16.mxu1 %v5758_v39 }
 0x276   : > { %1692 = vmatmul.mubr.bf16.gmra.mrb[12].mxu0 %v1493_v19 }
 0x277   : > { %4609 = vmatpush3.bf16.msra.mxu0 %v5200_v49 }
 0x278   : > { %4885 = vmatpush3.bf16.msra.mxu1 %v5201_v50  ;;  %4610 = vmatprep.subr.bf16.mxu0 %v5202_v51 }
 0x279   : > { %4886 = vmatprep.subr.bf16.mxu1 %v5758_v39 }
 0x27b   : > { %4611 = vmatpush3.bf16.msra.mxu0 %v5203_v52 }
 0x27c   : > { %4887 = vmatpush3.bf16.msra.mxu1 %v5204_v53  ;;  %4612 = vmatprep.subr.bf16.mxu0 %v5205_v54 }
 0x27d   : > { %4888 = vmatprep.subr.bf16.mxu1 %v5758_v39 }
 0x27f   : > { %4613 = vmatpush3.bf16.msra.mxu0 %v5206_v55 }
 0x280   : > { %4889 = vmatpush3.bf16.msra.mxu1 %v5207_v57  ;;  %4614 = vmatprep.subr.bf16.mxu0 %v5208_v58 }
 0x281   : > { %4890 = vmatprep.subr.bf16.mxu1 %v5758_v39 }
 0x283   : > { %4615 = vmatpush3.bf16.msra.mxu0 %v5209_v59 }
 0x284   : > { %4891 = vmatpush3.bf16.msra.mxu1 %v5210_v61  ;;  %4616 = vmatprep.subr.bf16.mxu0 %v5211_v62 }
 0x285   : > { %4892 = vmatprep.subr.bf16.mxu1 %v5758_v39 }
 0x287   : > { %4617 = vmatpush3.bf16.msra.mxu0 %v5212_v63 }
 0x288   : > { %4893 = vmatpush3.bf16.msra.mxu1 %v5213_v1  ;;  %4618 = vmatprep.subr.bf16.mxu0 %v5214_v2 }
 0x289   : > { %4644 = vmatprep.subr.bf16.mxu1 %v5217_v5 }
 0x28b   : > { %4619 = vmatpush3.bf16.msra.mxu0 %v5215_v4 }
 0x28c   : > { %4898 = vmatprep.subr.bf16.mxu0 %v5758_v39 }
 0x33e   : > { %v4876_v6 = vpop.f32.mrb[4].mxu1 }
 0x33f   : > { %v1733_v7 = vpop.f32.mrb[5].mxu1 }
 0x340   : > { %v4877_v8 = vpop.f32.mrb[6].mxu1 }
 0x341   : > { %v4582_v9 = vpop.f32.mrb[8].mxu0  ;;  %v1736_v10 = vpop.f32.mrb[7].mxu1 }
 0x342   : > { %v4583_v11 = vpop.f32.mrb[9].mxu0 }
 0x343   : > { %v4584_v12 = vadd.f32 %v4583_v11, %v4582_v9  ;;  %v4585_v13 = vpop.f32.mrb[10].mxu0 }
 0x344   : > { %v4586_v15 = vpop.f32.mrb[11].mxu0 }
 0x345   : > { %v1734_v16 = vadd.f32 %v4584_v12, %v1733_v7  ;;  %v4587_v17 = vadd.f32 %v4586_v15, %v4585_v13 }
 0x347   : > { %v1754_v19 = vmul.f32 %v4332_v14, %v1734_v16  ;;  %v1737_v20 = vadd.f32 %v4587_v17, %v1736_v10 }
 0x349   : > { %v1764_v21 = vadd.f32 %v4333_v18, %v1754_v19  ;;  %v1755_v22 = vmul.f32 %v4332_v14, %v1737_v20  ;;  %v4588_v23 = vpop.f32.mrb[12].mxu0 }
 0x34a   : > { %v4589_v24 = vpop.f32.mrb[13].mxu0 }
 0x34b   : > { %5358 = vtanh.f32 %v1764_v21  ;;  %v1765_v25 = vadd.f32 %v4333_v18, %v1755_v22  ;;  %v4590_v26 = vadd.f32 %v4589_v24, %v4588_v23  ;;  %v4591_v27 = vpop.f32.mrb[14].mxu0  ;;  %v5219_v24 = vld [vmem:[#allocation13] sm:$0xff]  }
 0x34c   : > { %v4592_v28 = vpop.f32.mrb[15].mxu0 }
 0x34d   : > { %5360 = vtanh.f32 %v1765_v25  ;;  %v1742_v30 = vadd.f32 %v4876_v6, %v4590_v26  ;;  %v5220_v28 = vld [vmem:[#allocation13 + $0x48] sm:$0xff]  }
 0x34f   : > { %v1756_v32 = vmul.f32 %v4332_v14, %v1742_v30 }
 0x351   : > { %v1766_v33 = vadd.f32 %v4333_v18, %v1756_v32 }
 0x353   : > { %5362 = vtanh.f32 %v1766_v33 }
 0x355   : > { %v5359_v34 = vpop.eup %5358 }
 0x356   : > { %v1774_v35 = vrot.slane %v5359_v34, 3  ;;  %v5216_v34 = vld [vmem:[#allocation11] sm:$0xff]  }
 0x357   : > { %v5361_v36 = vpop.eup %5360 }
 0x358   : > { %v1775_v38 = vrot.slane %v5361_v36, 3  ;;  %v1782_v41 = vsel %vm1009_vm3, %v1774_v35, 0.0 }
 0x35a   : > { %v1776_v42 = vsel %vm1773_vm7, %v1774_v35, %v1775_v38  ;;  %v5222_v35 = vld [vmem:[#allocation13 + $0x8] sm:$0xff]  }
 0x35b   : > { %v1785_v43 = vpack.c.bf16 %v1776_v42, %v1782_v41  ;;  %v5218_v41 = vld [vmem:[#allocation11 + $0x8] sm:$0xff]   ;;  %v5225_v42 = vld [vmem:[#allocation13 + $0x10] sm:$0xff]  }
 0x35d   : > { %v5363_v44 = vpop.eup %5362  ;;  %v1836_v45 = vshrl.u32 %v1785_v43, 16  ;;  %v1838_v47 = vshll.u32 %v1785_v43, 16  ;;  %v1852_v55 = vrot.slane %v1785_v43, 1  ;;  %v5226_v43 = vld [vmem:[#allocation13 + $0x58] sm:$0xff]  }
 0x35e   : > { %v1777_v48 = vrot.slane %v5363_v44, 3  ;;  %v5221_v44 = vld [vmem:[#allocation11 + $0x10] sm:$0xff]  }
 0x35f   : > { %v1840_v51 = vrot.slane %v1838_v47, 1  ;;  %v1856_v52 = vrot.slane %v1836_v45, 2  ;;  %v1857_v53 = vrot.slane %v1838_v47, 3  ;;  %v5224_v47 = vld [vmem:[#allocation11 + $0x18] sm:$0xff]  }
 0x360   : > { %v1778_v49 = vsel %vm1773_vm7, %v1775_v38, %v1777_v48  ;;  %v5223_v38 = vld [vmem:[#allocation13 + $0x50] sm:$0xff]   ;;  %v5231_v48 = vld [vmem:[#allocation13 + $0x20] sm:$0xff]  }
 0x361   : > { %v1784_v50 = vsel %vm1015_vm5, %v1778_v49, 0.0  ;;  %v1841_v61 = vor.u32 %v1840_v51, %v1836_v45  ;;  %v1858_v62 = vor.u32 %v1857_v53, %v1856_v52  ;;  %v5229_v45 = vld [vmem:[#allocation13 + $0x60] sm:$0xff]   ;;  %v5232_v49 = vld [vmem:[#allocation13 + $0x68] sm:$0xff]   ;;  %v5235_v52 = vld [vmem:[#allocation13 + $0x70] sm:$0xff]  }
 0x362   : > { %v1786_v54 = vpack.c.bf16 %v1784_v50, %v1784_v50  ;;  %v5227_v50 = vld [vmem:[#allocation11 + $0x20] sm:$0xff]   ;;  %v5234_v51 = vld [vmem:[#allocation13 + $0x28] sm:$0xff]  }
 0x363   : > { %v5230_v53 = vld [vmem:[#allocation11 + $0x28] sm:$0xff]  }
 0x364   : > { %v1853_v57 = vrot.slane %v1786_v54, 1  ;;  %v1843_v58 = vshll.u32 %v1786_v54, 16  ;;  %v1847_v59 = vshrl.u32 %v1786_v54, 16  ;;  %v5237_v54 = vld [vmem:[#allocation13 + $0x30] sm:$0xff]  }
 0x366   : > { %v1854_v63 = vsel %vm1085_vm1, %v1852_v55, %v1853_v57  ;;  %v1889_v1 = vshrl.u32 %v1853_v57, 16  ;;  %v1892_v2 = vshll.u32 %v1853_v57, 16  ;;  %v1845_v4 = vrot.slane %v1843_v58, 1  ;;  %v5238_v55 = vld [vmem:[#allocation13 + $0x78] sm:$0xff]   ;;  %v5233_v57 = vld [vmem:[#allocation11 + $0x30] sm:$0xff]  }
 0x367   : > { %v1881_v5 = vshrl.u32 %v1854_v63, 16  ;;  %v1884_v6 = vshll.u32 %v1854_v63, 16  ;;  %v1859_v7 = vrot.slane %v1847_v59, 2  ;;  %v1860_v8 = vrot.slane %v1843_v58, 3  ;;  %v5240_v58 = vld [vmem:[#allocation13 + $0x38] sm:$0xff]   ;;  %v5246_v63 = vld [vmem:[#allocation13 + $0x108] sm:$0xff]  }
 0x368   : > { %v1891_v9 = vrot.slane %v1889_v1, 2  ;;  %v1894_v10 = vrot.slane %v1892_v2, 3  ;;  %v1846_v11 = vsel %vm1069_vm0, %v1841_v61, %v1845_v4  ;;  %v1849_v12 = vor.u32 %v1847_v59, %v1845_v4  ;;  %v5243_v59 = vld [vmem:[#allocation13 + $0x100] sm:$0xff]   ;;  %v5236_v61 = vld [vmem:[#allocation11 + $0x38] sm:$0xff]   ;;  %v5242_v4 = vld [vmem:[#allocation13 + $0xc8] sm:$0xff]  }
 0x369   : > { %v1883_v13 = vrot.slane %v1881_v5, 2  ;;  %v1886_v14 = vrot.slane %v1884_v6, 3  ;;  %v1864_v15 = vshrl.u32 %v1846_v11, 16  ;;  %v1867_v16 = vshll.u32 %v1846_v11, 16  ;;  %v5384_v1 = vld [vmem:[%s6249_s23] sm:$0xff]   ;;  %v5249_v5 = vld [vmem:[#allocation13 + $0x110] sm:$0xff]  }
 0x36a   : > { %v1895_v17 = vor.u32 %v1894_v10, %v1891_v9  ;;  %v1872_v18 = vshrl.u32 %v1849_v12, 16  ;;  %v1875_v19 = vshll.u32 %v1849_v12, 16  ;;  %v1861_v20 = vor.u32 %v1860_v8, %v1859_v7  ;;  %v5241_v2 = vld [vmem:[#allocation13 + $0x80] sm:$0xff]   ;;  %v5385_v7 = vld [vmem:[%s6256_s11] sm:$0xff]   ;;  %v5244_v9 = vld [vmem:[#allocation13 + $0x88] sm:$0xff]   ;;  %s6701_s23 = sld [smem:[#allocation50_spill]] }
 0x36b   : > { %v1887_v21 = vor.u32 %v1886_v14, %v1883_v13  ;;  %v1866_v22 = vrot.slane %v1864_v15, 2  ;;  %v1869_v23 = vrot.slane %v1867_v16, 3  ;;  %v2396_v6 = vrot.slane %v5384_v1, 2  ;;  %v5245_v10 = vld [vmem:[#allocation13 + $0xd0] sm:$0xff]   ;;  %v5252_v11 = vld [vmem:[#allocation13 + $0x118] sm:$0xff]   ;;  %v5251_v15 = vld [vmem:[#allocation13 + $0xe0] sm:$0xff]  }
 0x36c   : > { %v1874_v25 = vrot.slane %v1872_v18, 2  ;;  %v1877_v26 = vrot.slane %v1875_v19, 3  ;;  %v1862_v27 = vsel %vm1855_vm9, %v1858_v62, %v1861_v20  ;;  %v5239_v62 = vld [vmem:[#allocation13 + $0xc0] sm:$0xff]   ;;  %v2397_v8 = vrot.slane %v5385_v7, 2  ;;  %v5247_v13 = vld [vmem:[#allocation13 + $0x90] sm:$0xff]   ;;  %v5250_v14 = vld [vmem:[#allocation13 + $0x98] sm:$0xff]  }
 0x36d   : > { %v1896_v30 = vsel %vm1855_vm9, %v1887_v21, %v1895_v17  ;;  %v1870_v32 = vor.u32 %v1869_v23, %v1866_v22  ;;  %v5258_v16 = vld [vmem:[#allocation13 + $0x128] sm:$0xff]   ;;  %v5261_v18 = vld [vmem:[#allocation13 + $0x130] sm:$0xff]   ;;  %v5263_v21 = vld [vmem:[#allocation13 + $0x138] sm:$0xff]  }
 0x36e   : > { %4895 = vmatmul.mubr.bf16.vlgmr.msra.gmra.mrb[8].mxu1 %v1896_v30  ;;  %v1878_v33 = vor.u32 %v1877_v26, %v1874_v25  ;;  %v2398_v12 = vsel %vm1491_vm6, %v2396_v6, %v2397_v8  ;;  %v5254_v17 = vld [vmem:[#allocation13 + $0xe8] sm:$0xff]   ;;  %v5257_v20 = vld [vmem:[#allocation13 + $0xf0] sm:$0xff]   ;;  %v5260_v23 = vld [vmem:[#allocation13 + $0xf8] sm:$0xff]  }
 0x36f   : > { %4645 = vmatpush3.bf16.msra.mxu1 %v5219_v24  ;;  %2673 = vmatprep.mubr.bf16.mxu1 %v6293_v46  ;;  %v5228_v46 = vld [vmem:[#allocation13 + $0x18] sm:$0xff]   ;;  %v5256_v19 = vld [vmem:[#allocation13 + $0xa8] sm:$0xff]   ;;  %v5259_v22 = vld [vmem:[#allocation13 + $0xb0] sm:$0xff]  }
 0x370   : > { %v1879_v36 = vsel %vm1855_vm9, %v1870_v32, %v1878_v33  ;;  %4646 = vmatprep.subr.bf16.mxu1 %v5220_v28  ;;  %v5262_v24 = vld [vmem:[#allocation13 + $0xb8] sm:$0xff]   ;;  %v5264_v25 = vld [vmem:[#allocation14 + $0x40] sm:$0xff]   ;;  %v5268_v30 = vld [vmem:[#allocation14 + $0x48] sm:$0xff]  }
 0x371   : > { %2076 = vmatprep.mubr.bf16.mxu0 %v1879_v36  ;;  %v5265_v26 = vld [vmem:[#allocation14] sm:$0xff]   ;;  %v5269_v32 = vld [vmem:[#allocation14 + $0x8] sm:$0xff]   ;;  %v5276_v36 = vld [vmem:[#allocation14 + $0x58] sm:$0xff]  }
 0x372   : > { %2077 = vmatmul.mubr.bf16.vlgmr.msra.gmra.mrb[16].mxu0 %v1862_v27  ;;  %v5266_v27 = vld [vmem:[#allocation14 + $0xc0] sm:$0xff]   ;;  %v5270_v33 = vld [vmem:[#allocation14 + $0xc8] sm:$0xff]  }
 0x373   : > { %4899 = vmatpush3.bf16.msra.mxu0 %v5216_v34  ;;  %4647 = vmatpush3.bf16.msra.mxu1 %v5222_v35  ;;  %v5267_v28 = vld [vmem:[#allocation14 + $0x80] sm:$0xff]   ;;  %v5271_v34 = vld [vmem:[#allocation14 + $0x88] sm:$0xff]   ;;  %v5275_v35 = vld [vmem:[#allocation14 + $0x90] sm:$0xff]  }
 0x374   : > { %4900 = vmatprep.subr.bf16.mxu0 %v5758_v39  ;;  %4648 = vmatprep.subr.bf16.mxu1 %v5223_v38  ;;  %v5277_v38 = vld [vmem:[#allocation14 + $0x18] sm:$0xff]  }
 0x375   : > { %4914 = vmatprep.mubr.msk.bf16.mxu0 %vm5759_vm8, %v5758_v39 }
 0x377   : > { %4901 = vmatpush3.bf16.msra.mxu0 %v5218_v41  ;;  %4649 = vmatpush3.bf16.msra.mxu1 %v5225_v42  ;;  %v5278_v41 = vld [vmem:[#allocation14 + $0xd8] sm:$0xff]  }
 0x378   : > { %4902 = vmatprep.subr.bf16.mxu0 %v5758_v39  ;;  %4650 = vmatprep.subr.bf16.mxu1 %v5226_v43  ;;  %v5279_v42 = vld [vmem:[#allocation14 + $0x98] sm:$0xff]   ;;  %v5280_v43 = vld [vmem:[#allocation14 + $0x60] sm:$0xff]  }
 0x37b   : > { %4903 = vmatpush3.bf16.msra.mxu0 %v5221_v44  ;;  %4651 = vmatpush3.bf16.msra.mxu1 %v5228_v46  ;;  %v5281_v44 = vld [vmem:[#allocation14 + $0x20] sm:$0xff]  }
 0x37c   : > { %4904 = vmatprep.subr.bf16.mxu0 %v5758_v39  ;;  %4652 = vmatprep.subr.bf16.mxu1 %v5229_v45  ;;  %v5282_v46 = vld [vmem:[#allocation14 + $0xe0] sm:$0xff]  }
 0x37d   : > { %v5283_v45 = vld [vmem:[#allocation14 + $0xa0] sm:$0xff]  }
 0x37f   : > { %4905 = vmatpush3.bf16.msra.mxu0 %v5224_v47  ;;  %4653 = vmatpush3.bf16.msra.mxu1 %v5231_v48  ;;  %v5284_v47 = vld [vmem:[#allocation14 + $0x68] sm:$0xff]  }
 0x380   : > { %4906 = vmatprep.subr.bf16.mxu0 %v5758_v39  ;;  %4654 = vmatprep.subr.bf16.mxu1 %v5232_v49  ;;  %v5285_v48 = vld [vmem:[#allocation14 + $0x28] sm:$0xff]  }
 0x381   : > { %v5286_v49 = vld [vmem:[#allocation14 + $0xe8] sm:$0xff]  }
 0x383   : > { %4907 = vmatpush3.bf16.msra.mxu0 %v5227_v50  ;;  %4655 = vmatpush3.bf16.msra.mxu1 %v5234_v51  ;;  %v5287_v50 = vld [vmem:[#allocation14 + $0xa8] sm:$0xff]   ;;  %v5288_v51 = vld [vmem:[#allocation14 + $0x70] sm:$0xff]  }
 0x384   : > { %4908 = vmatprep.subr.bf16.mxu0 %v5758_v39  ;;  %4656 = vmatprep.subr.bf16.mxu1 %v5235_v52  ;;  %v5289_v52 = vld [vmem:[#allocation14 + $0x30] sm:$0xff]  }
 0x387   : > { %4909 = vmatpush3.bf16.msra.mxu0 %v5230_v53  ;;  %4657 = vmatpush3.bf16.msra.mxu1 %v5237_v54  ;;  %v5290_v53 = vld [vmem:[#allocation14 + $0xf0] sm:$0xff]   ;;  %v5292_v54 = vld [vmem:[#allocation14 + $0x78] sm:$0xff]  }
 0x388   : > { %4910 = vmatprep.subr.bf16.mxu0 %v5758_v39  ;;  %4658 = vmatprep.subr.bf16.mxu1 %v5238_v55  ;;  %v5291_v55 = vld [vmem:[#allocation14 + $0xb0] sm:$0xff]  }
 0x38b   : > { %4911 = vmatpush3.bf16.msra.mxu0 %v5233_v57  ;;  %4659 = vmatpush3.bf16.msra.mxu1 %v5240_v58  ;;  %v5294_v57 = vld [vmem:[#allocation14 + $0xf8] sm:$0xff]  }
 0x38c   : > { %4912 = vmatprep.subr.bf16.mxu0 %v5758_v39  ;;  %4918 = vmatprep.subr.bf16.mxu1 %v5243_v59  ;;  %v5293_v58 = vld [vmem:[#allocation14 + $0x38] sm:$0xff]  }
 0x38e   : > { %2674 = vmatmul.mubr.bf16.vlgmr.msra.gmra.mrb[12].mxu1 %v5384_v1 }
 0x38f   : > { %4913 = vmatpush3.bf16.msra.mxu0 %v5236_v61  ;;  %4919 = vmatpush3.bf16.msra.mxu1 %v5243_v59  ;;  %v5295_v59 = vld [vmem:[#allocation14 + $0xb8] sm:$0xff]   ;;  %v6382_v61 = vld [vmem:[#allocation14 + $0x100] sm:$0xff]  }
 0x390   : > { %4672 = vmatprep.subr.bf16.mxu0 %v5239_v62  ;;  %4920 = vmatprep.subr.bf16.mxu1 %v5246_v63 }
 0x391   : > { %2681 = vmatprep.mubr.bf16.mxu1 %v6287_v40  ;;  %v5248_v40 = vld [vmem:[#allocation13 + $0xd8] sm:$0xff]  }
 0x392   : > { %4915 = vmatmul.mubr.bf16.vlgmr.msra.gmra.mrb[20].mxu0 %v6330_v29  ;;  %v5255_v29 = vld [vmem:[#allocation13 + $0x120] sm:$0xff]  }
 0x393   : > { %4673 = vmatpush3.bf16.msra.mxu0 %v5241_v2  ;;  %4921 = vmatpush3.bf16.msra.mxu1 %v5246_v63 }
 0x394   : > { %4674 = vmatprep.subr.bf16.mxu0 %v5242_v4  ;;  %4922 = vmatprep.subr.bf16.mxu1 %v5249_v5 }
 0x395   : > { %2721 = vmatprep.mubr.bf16.mxu0 %v6303_v0  ;;  %v5253_v0 = vld [vmem:[#allocation13 + $0xa0] sm:$0xff]  }
 0x396   : > { %2682 = vmatmul.mubr.bf16.gmra.mrb[16].mxu1 %v5385_v7 }
 0x397   : > { %4675 = vmatpush3.bf16.msra.mxu0 %v5244_v9  ;;  %4923 = vmatpush3.bf16.msra.mxu1 %v5249_v5 }
 0x398   : > { %4676 = vmatprep.subr.bf16.mxu0 %v5245_v10  ;;  %4924 = vmatprep.subr.bf16.mxu1 %v5252_v11 }
 0x399   : > { %4934 = vmatprep.mubr.bf16.mxu1 %v2398_v12  ;;  %v4358_v12 = vld [vmem:[%s6693_s8] ss:$0 sm:$0xff]  ;;  %s6700_s8 = sld [smem:[#allocation46_spill]] }
 0x39b   : > { %4677 = vmatpush3.bf16.msra.mxu0 %v5247_v13  ;;  %4925 = vmatpush3.bf16.msra.mxu1 %v5252_v11 }
 0x39c   : > { %4678 = vmatprep.subr.bf16.mxu0 %v5248_v40  ;;  %4926 = vmatprep.subr.bf16.mxu1 %v5255_v29 }
 0x39f   : > { %4679 = vmatpush3.bf16.msra.mxu0 %v5250_v14  ;;  %4927 = vmatpush3.bf16.msra.mxu1 %v5255_v29  ;;  %v4368_v29 = vld [vmem:[%s6594_s12] ss:$0 sm:$0xff] }
 0x3a0   : > { %4680 = vmatprep.subr.bf16.mxu0 %v5251_v15  ;;  %4928 = vmatprep.subr.bf16.mxu1 %v5258_v16 }
 0x3a3   : > { %4681 = vmatpush3.bf16.msra.mxu0 %v5253_v0  ;;  %4929 = vmatpush3.bf16.msra.mxu1 %v5258_v16 }
 0x3a4   : > { %4682 = vmatprep.subr.bf16.mxu0 %v5254_v17  ;;  %4930 = vmatprep.subr.bf16.mxu1 %v5261_v18  ;;  %v4359_v17 = vld [vmem:[%s6694_s0] ss:$0 sm:$0xff] }
 0x3a7   : > { %4683 = vmatpush3.bf16.msra.mxu0 %v5256_v19  ;;  %4931 = vmatpush3.bf16.msra.mxu1 %v5261_v18  ;;  %v4369_v19 = vld [vmem:[%s6595_s13] ss:$0 sm:$0xff] }
 0x3a8   : > { %4684 = vmatprep.subr.bf16.mxu0 %v5257_v20  ;;  %4932 = vmatprep.subr.bf16.mxu1 %v5263_v21 }
 0x3ab   : > { %4685 = vmatpush3.bf16.msra.mxu0 %v5259_v22  ;;  %4933 = vmatpush3.bf16.msra.mxu1 %v5263_v21 }
 0x3ac   : > { %4686 = vmatprep.subr.bf16.mxu0 %v5260_v23  ;;  %4738 = vmatprep.subr.bf16.mxu1 %v5266_v27 }
 0x3ae   : > { %4935 = vmatmul.mubr.bf16.vlgmr.msra.gmra.mrb[20].mxu1 %v2397_v8 }
 0x3af   : > { %4687 = vmatpush3.bf16.msra.mxu0 %v5262_v24  ;;  %4739 = vmatpush3.bf16.msra.mxu1 %v5267_v28 }
 0x3b0   : > { %4710 = vmatprep.subr.bf16.mxu0 %v5264_v25  ;;  %4740 = vmatprep.subr.bf16.mxu1 %v5270_v33 }
 0x3b2   : > { %2722 = vmatmul.mubr.bf16.vlgmr.msra.gmra.mrb[24].mxu0 %v6284_v37  ;;  %v5272_v37 = vld [vmem:[#allocation14 + $0x50] sm:$0xff]  }
 0x3b3   : > { %2729 = vmatprep.mubr.bf16.mxu0 %v6299_v56  ;;  %4711 = vmatpush3.bf16.msra.mxu0 %v5265_v26  ;;  %v5273_v56 = vld [vmem:[#allocation14 + $0x10] sm:$0xff]  }
 0x3b4   : > { %4712 = vmatprep.subr.bf16.mxu0 %v5268_v30  ;;  %4741 = vmatpush3.bf16.msra.mxu1 %v5271_v34 }
 0x3b7   : > { %4713 = vmatpush3.bf16.msra.mxu0 %v5269_v32 }
 0x3b8   : > { %4714 = vmatprep.subr.bf16.mxu0 %v5272_v37 }
 0x3ba   : > { %2730 = vmatmul.mubr.bf16.gmra.mrb[28].mxu0 %v6280_v31  ;;  %v5274_v31 = vld [vmem:[#allocation14 + $0xd0] sm:$0xff]  }
 0x3bb   : > { %4715 = vmatpush3.bf16.msra.mxu0 %v5273_v56  ;;  %4742 = vmatprep.subr.bf16.mxu1 %v5274_v31 }
 0x3bc   : > { %4743 = vmatpush3.bf16.msra.mxu1 %v5275_v35  ;;  %4716 = vmatprep.subr.bf16.mxu0 %v5276_v36 }
 0x3bd   : > { %4744 = vmatprep.subr.bf16.mxu1 %v5278_v41 }
 0x3bf   : > { %4717 = vmatpush3.bf16.msra.mxu0 %v5277_v38 }
 0x3c0   : > { %4745 = vmatpush3.bf16.msra.mxu1 %v5279_v42  ;;  %4718 = vmatprep.subr.bf16.mxu0 %v5280_v43 }
 0x3c1   : > { %4746 = vmatprep.subr.bf16.mxu1 %v5282_v46 }
 0x3c3   : > { %4719 = vmatpush3.bf16.msra.mxu0 %v5281_v44 }
 0x3c4   : > { %4747 = vmatpush3.bf16.msra.mxu1 %v5283_v45  ;;  %4720 = vmatprep.subr.bf16.mxu0 %v5284_v47 }
 0x3c5   : > { %4748 = vmatprep.subr.bf16.mxu1 %v5286_v49 }
 0x3c7   : > { %4721 = vmatpush3.bf16.msra.mxu0 %v5285_v48 }
 0x3c8   : > { %4722 = vmatprep.subr.bf16.mxu0 %v5288_v51  ;;  %4749 = vmatpush3.bf16.msra.mxu1 %v5287_v50 }
 0x3c9   : > { %4750 = vmatprep.subr.bf16.mxu1 %v5290_v53 }
 0x3cb   : > { %4723 = vmatpush3.bf16.msra.mxu0 %v5289_v52 }
 0x3cc   : > { %4724 = vmatprep.subr.bf16.mxu0 %v5292_v54  ;;  %4751 = vmatpush3.bf16.msra.mxu1 %v5291_v55 }
 0x3cd   : > { %4752 = vmatprep.subr.bf16.mxu1 %v5294_v57 }
 0x3cf   : > { %4725 = vmatpush3.bf16.msra.mxu0 %v5293_v58 }
 0x3d0   : > { %4753 = vmatpush3.bf16.msra.mxu1 %v5295_v59  ;;  %4938 = vmatprep.subr.bf16.mxu0 %v6382_v61 }
 0x441   : > { %v2119_v62 = vpop.f32.mrb[8].mxu1 }
 0x442   : > { %v4896_v63 = vpop.f32.mrb[9].mxu1 }
 0x443   : > { %v2122_v1 = vpop.f32.mrb[10].mxu1 }
 0x444   : > { %v4897_v2 = vpop.f32.mrb[11].mxu1 }
 0x445   : > { %v4620_v4 = vpop.f32.mrb[16].mxu0 }
 0x446   : > { %v4621_v5 = vpop.f32.mrb[17].mxu0 }
 0x447   : > { %v4622_v6 = vadd.f32 %v4621_v5, %v4620_v4  ;;  %v4623_v7 = vpop.f32.mrb[18].mxu0 }
 0x448   : > { %v4624_v8 = vpop.f32.mrb[19].mxu0 }
 0x449   : > { %v2120_v9 = vadd.f32 %v4622_v6, %v2119_v62  ;;  %v4625_v10 = vadd.f32 %v4624_v8, %v4623_v7 }
 0x44b   : > { %v2123_v11 = vadd.f32 %v4625_v10, %v2122_v1  ;;  %v2133_v16 = vmul.f32 %v4358_v12, %v2120_v9  ;;  %v4414_v9 = vld [vmem:[%s6697_s25] ss:$0 sm:$0xff]  ;;  %s6706_s25 = sld [smem:[#allocation25_spill]] }
 0x44d   : > { %v2134_v21 = vmul.f32 %v4358_v12, %v2123_v11  ;;  %v2142_v25 = vadd.f32 %v4359_v17, %v2133_v16  ;;  %v4415_v12 = vld [vmem:[%s6698_s20] ss:$0 sm:$0xff] }
 0x44f   : > { %v2143_v33 = vadd.f32 %v4359_v17, %v2134_v21 }
 0x451   : > { %s4527_s6 = sshll.u32 %s6706_s25, 8 }
 0x461   : > { %v4660_v13 = vpop.f32.mrb[12].mxu1 }
 0x462   : > { %v4661_v40 = vpop.f32.mrb[13].mxu1 }
 0x463   : > { %v4662_v14 = vadd.f32 %v4661_v40, %v4660_v13  ;;  %v4663_v15 = vpop.f32.mrb[14].mxu1 }
 0x464   : > { %v4664_v0 = vpop.f32.mrb[15].mxu1 }
 0x465   : > { %v2247_v18 = vpop.f32.mrb[20].mxu0  ;;  %v4665_v20 = vadd.f32 %v4664_v0, %v4663_v15 }
 0x466   : > { %v2261_v22 = vmul.f32 %v4368_v29, %v2247_v18  ;;  %v4916_v23 = vpop.f32.mrb[21].mxu0 }
 0x467   : > { %v2250_v24 = vpop.f32.mrb[22].mxu0 }
 0x468   : > { %v2270_v26 = vadd.f32 %v4369_v19, %v2261_v22  ;;  %v2262_v27 = vmul.f32 %v4368_v29, %v2250_v24  ;;  %v4917_v28 = vpop.f32.mrb[23].mxu0 }
 0x469   : > { %v4666_v30 = vpop.f32.mrb[16].mxu1 }
 0x46a   : > { %v2272_v32 = vadd.f32 %v2270_v26, %v2142_v25  ;;  %v2271_v34 = vadd.f32 %v4369_v19, %v2262_v27  ;;  %v4667_v37 = vpop.f32.mrb[17].mxu1 }
 0x46b   : > { %v4668_v56 = vadd.f32 %v4667_v37, %v4666_v30  ;;  %v4669_v31 = vpop.f32.mrb[18].mxu1 }
 0x46c   : > { %5364 = vtanh.f32 %v2272_v32  ;;  %v2273_v35 = vadd.f32 %v2271_v34, %v2143_v33  ;;  %v4670_v36 = vpop.f32.mrb[19].mxu1 }
 0x46e   : > { %5366 = vtanh.f32 %v2273_v35 }
 0x476   : > { %v5365_v38 = vpop.eup %5364 }
 0x477   : > { %v2279_v41 = vrot.slane %v5365_v38, 2 }
 0x478   : > { %v5367_v42 = vpop.eup %5366 }
 0x479   : > { %v2285_v43 = vsel %vm1009_vm3, %v2279_v41, 0.0  ;;  %v2280_v44 = vrot.slane %v5367_v42, 2 }
 0x47a   : > { %v4521_v46 = vpack.c.bf16 %v2285_v43, %v2285_v43 }
 0x47b   : > { %v2281_v45 = vsel %vm1491_vm6, %v2279_v41, %v2280_v44  ;;  %v2287_v47 = vsel %vm1015_vm5, %v2280_v44, 0.0 }
 0x47c   : > { %v4522_v48 = vpack.c.bf16 %v2281_v45, %v2281_v45  ;;  %v4523_v49 = vpack.c.bf16 %v2287_v47, %v2287_v47  ;;  %v4373_v51 = vrot.slane %v4521_v46, 11 }
 0x47e   : > { %v2303_v52 = vrot.slane %v4522_v48, 7  ;;  %v2306_v55 = vrot.slane %v4523_v49, 7 }
 0x480   : > { %v2304_v53 = vsel %vm6403_vm12, %v4373_v51, %v2303_v52  ;;  %v2305_v54 = vrot.slane %v2303_v52, 4 }
 0x481   : > { %2310 = vst [vmem:[%s6409_s18] sm:$0xf] %v2304_v53  ;;  %v4936_v57 = vpop.f32.mrb[20].mxu1 }
 0x482   : > { %v2307_v58 = vsel %vm6403_vm12, %v2305_v54, %v2306_v55  ;;  %v2771_v59 = vpop.f32.mrb[21].mxu1 }
 0x483   : > { %2311 = vst [vmem:[%s6409_s18 + $0x8] sm:$0xf] %v2307_v58  ;;  %v4937_v62 = vpop.f32.mrb[22].mxu1 }
 0x484   : > { %v2774_v63 = vpop.f32.mrb[23].mxu1 }
 0x485   : > { %v4688_v1 = vpop.f32.mrb[24].mxu0 }
 0x486   : > { %v4689_v2 = vpop.f32.mrb[25].mxu0 }
 0x487   : > { %v4690_v4 = vadd.f32 %v4689_v2, %v4688_v1  ;;  %v4691_v5 = vpop.f32.mrb[26].mxu0 }
 0x488   : > { %v4692_v6 = vpop.f32.mrb[27].mxu0 }
 0x489   : > { %v4693_v7 = vadd.f32 %v4692_v6, %v4691_v5  ;;  %v2724_v8 = vadd.f32 %v4690_v4, %v4662_v14 }
 0x48b   : > { %v2772_v10 = vadd.f32 %v2771_v59, %v2724_v8  ;;  %v2727_v11 = vadd.f32 %v4693_v7, %v4665_v20 }
 0x48d   : > { %v2792_v13 = vmul.f32 %v4414_v9, %v2772_v10  ;;  %v2775_v40 = vadd.f32 %v2774_v63, %v2727_v11  ;;  %v4694_v29 = vpop.f32.mrb[28].mxu0 }
 0x48e   : > { %v4695_v15 = vpop.f32.mrb[29].mxu0 }
 0x48f   : > { %v2802_v16 = vadd.f32 %v4415_v12, %v2792_v13  ;;  %v2793_v0 = vmul.f32 %v4414_v9, %v2775_v40  ;;  %v4696_v17 = vadd.f32 %v4695_v15, %v4694_v29  ;;  %v4697_v18 = vpop.f32.mrb[30].mxu0  ;;  %v5297_v15 = vld [vmem:[#allocation14 + $0x108] sm:$0xff]  }
 0x490   : > { %v4698_v19 = vpop.f32.mrb[31].mxu0  ;;  %v5300_v18 = vld [vmem:[#allocation14 + $0x120] sm:$0xff]  }
 0x491   : > { %5368 = vtanh.f32 %v2802_v16  ;;  %v2803_v14 = vadd.f32 %v4415_v12, %v2793_v0  ;;  %v2732_v21 = vadd.f32 %v4696_v17, %v4668_v56  ;;  %v5298_v0 = vld [vmem:[#allocation14 + $0x110] sm:$0xff]   ;;  %v5299_v17 = vld [vmem:[#allocation14 + $0x118] sm:$0xff]   ;;  %v5301_v19 = vld [vmem:[#allocation14 + $0x128] sm:$0xff]  }
 0x493   : > { %5370 = vtanh.f32 %v2803_v14  ;;  %v2780_v22 = vadd.f32 %v4936_v57, %v2732_v21  ;;  %v5303_v14 = vld [vmem:[#allocation14 + $0x138] sm:$0xff]   ;;  %v5304_v21 = vld [vmem:[#allocation16 + $0x40] sm:$0xff]  }
 0x494   : > { %4776 = vmatprep.subr.bf16.mxu1 %v5304_v21 }
 0x495   : > { %v2794_v23 = vmul.f32 %v4414_v9, %v2780_v22  ;;  %v5305_v22 = vld [vmem:[#allocation16] sm:$0xff]  }
 0x497   : > { %v2804_v20 = vadd.f32 %v4415_v12, %v2794_v23  ;;  %v5306_v23 = vld [vmem:[#allocation16 + $0xc0] sm:$0xff]  }
 0x499   : > { %5372 = vtanh.f32 %v2804_v20  ;;  %v5307_v20 = vld [vmem:[#allocation16 + $0x80] sm:$0xff]  }
 0x49b   : > { %v5369_v24 = vpop.eup %5368 }
 0x49c   : > { %v2814_v25 = vrot.slane %v5369_v24, 6  ;;  %v5308_v24 = vld [vmem:[#allocation16 + $0x48] sm:$0xff]  }
 0x49d   : > { %v5371_v26 = vpop.eup %5370 }
 0x49e   : > { %v2815_v27 = vrot.slane %v5371_v26, 6  ;;  %v2823_v28 = vsel %vm1009_vm3, %v2814_v25, 0.0  ;;  %v5310_v26 = vld [vmem:[#allocation16 + $0xc8] sm:$0xff]  }
 0x4a0   : > { %v2816_v30 = vsel %vm2813_vm13, %v2814_v25, %v2815_v27  ;;  %v5309_v25 = vld [vmem:[#allocation16 + $0x8] sm:$0xff]  }
 0x4a1   : > { %v2827_v32 = vpack.c.bf16 %v2816_v30, %v2823_v28  ;;  %v5312_v28 = vld [vmem:[#allocation16 + $0x50] sm:$0xff]  }
 0x4a2   : > { %v5313_v30 = vld [vmem:[#allocation16 + $0x10] sm:$0xff]  }
 0x4a3   : > { %v5373_v33 = vpop.eup %5372  ;;  %v2910_v34 = vshrl.u32 %v2827_v32, 16  ;;  %v2912_v37 = vshll.u32 %v2827_v32, 16  ;;  %v2926_v43 = vrot.slane %v2827_v32, 1  ;;  %v2936_v44 = vrot.slane %v2827_v32, 2 }
 0x4a4   : > { %v2817_v31 = vrot.slane %v5373_v33, 6  ;;  %v3908_v52 = vrot.slane %v2827_v32, 3  ;;  %v5314_v32 = vld [vmem:[#allocation16 + $0xd0] sm:$0xff]  }
 0x4a5   : > { %v2914_v36 = vrot.slane %v2912_v37, 1  ;;  %v2929_v38 = vrot.slane %v2910_v34, 1  ;;  %v2930_v41 = vrot.slane %v2912_v37, 2  ;;  %v5315_v33 = vld [vmem:[#allocation16 + $0x90] sm:$0xff]   ;;  %v5317_v37 = vld [vmem:[#allocation16 + $0x18] sm:$0xff]  }
 0x4a6   : > { %v2818_v56 = vsel %vm2813_vm13, %v2815_v27, %v2817_v31  ;;  %v5311_v27 = vld [vmem:[#allocation16 + $0x88] sm:$0xff]   ;;  %v5318_v31 = vld [vmem:[#allocation16 + $0xd8] sm:$0xff]  }
 0x4a7   : > { %v2825_v35 = vsel %vm1015_vm5, %v2818_v56, 0.0  ;;  %v2915_v49 = vor.u32 %v2914_v36, %v2910_v34  ;;  %v2931_v51 = vor.u32 %v2930_v41, %v2929_v38  ;;  %v5316_v34 = vld [vmem:[#allocation16 + $0x58] sm:$0xff]   ;;  %v5321_v36 = vld [vmem:[#allocation16 + $0x20] sm:$0xff]  }
 0x4a8   : > { %v2828_v42 = vpack.c.bf16 %v5758_v39, %v2825_v35  ;;  %v5319_v56 = vld [vmem:[#allocation16 + $0x98] sm:$0xff]   ;;  %v5320_v35 = vld [vmem:[#allocation16 + $0x60] sm:$0xff]  }
 0x4a9   : > { %v5322_v38 = vld [vmem:[#allocation16 + $0xe0] sm:$0xff]  }
 0x4aa   : > { %v2917_v46 = vshll.u32 %v2828_v42, 16  ;;  %v2921_v45 = vshrl.u32 %v2828_v42, 16  ;;  %v2927_v47 = vrot.slane %v2828_v42, 1  ;;  %v2937_v48 = vrot.slane %v2828_v42, 2  ;;  %v5323_v41 = vld [vmem:[#allocation16 + $0xa0] sm:$0xff]  }
 0x4ab   : > { %v3909_v53 = vrot.slane %v2828_v42, 3  ;;  %v5324_v42 = vld [vmem:[#allocation16 + $0x68] sm:$0xff]  }
 0x4ac   : > { %v2919_v54 = vrot.slane %v2917_v46, 1  ;;  %v2928_v55 = vsel %vm1085_vm1, %v2926_v43, %v2927_v47  ;;  %v2932_v57 = vrot.slane %v2921_v45, 1  ;;  %v2933_v58 = vrot.slane %v2917_v46, 2  ;;  %v5325_v43 = vld [vmem:[#allocation16 + $0x28] sm:$0xff]  }
 0x4ad   : > { %v2942_v59 = vrot.slane %v2928_v55, 1  ;;  %v2943_v62 = vrot.slane %v2927_v47, 1  ;;  %v2938_v63 = vsel %vm1491_vm6, %v2936_v44, %v2937_v48  ;;  %v2949_v1 = vrot.slane %v2937_v48, 1  ;;  %v5326_v44 = vld [vmem:[#allocation16 + $0xe8] sm:$0xff]   ;;  %v5330_v48 = vld [vmem:[#allocation16 + $0xf0] sm:$0xff]  }
 0x4ae   : > { %v2920_v2 = vsel %vm1069_vm0, %v2915_v49, %v2919_v54  ;;  %v2923_v4 = vor.u32 %v2921_v45, %v2919_v54  ;;  %v2934_v5 = vor.u32 %v2933_v58, %v2932_v57  ;;  %v2948_v6 = vrot.slane %v2938_v63, 1  ;;  %v5327_v46 = vld [vmem:[#allocation16 + $0xa8] sm:$0xff]   ;;  %v5328_v45 = vld [vmem:[#allocation16 + $0x70] sm:$0xff]   ;;  %v5335_v54 = vld [vmem:[#allocation16 + $0xb8] sm:$0xff]  }
 0x4af   : > { %v2939_v7 = vrot.slane %v2920_v2, 1  ;;  %v2944_v8 = vsel %vm1085_vm1, %v2942_v59, %v2943_v62  ;;  %v6431_v9 = vsel %vm1773_vm7, %v3908_v52, %v3909_v53  ;;  %v5331_v49 = vld [vmem:[#allocation16 + $0xb0] sm:$0xff]   ;;  %v5334_v52 = vld [vmem:[#allocation16 + $0xf8] sm:$0xff]  }
 0x4b0   : > { %v2940_v10 = vrot.slane %v2923_v4, 1  ;;  %v2935_v11 = vsel %vm1089_vm2, %v2931_v51, %v2934_v5  ;;  %v2946_v12 = vrot.slane %v2934_v5, 1  ;;  %v2950_v13 = vsel %vm1085_vm1, %v2948_v6, %v2949_v1  ;;  %v5332_v51 = vld [vmem:[#allocation16 + $0x78] sm:$0xff]  }
 0x4b1   : > { %v2945_v40 = vrot.slane %v2935_v11, 1  ;;  %v5333_v53 = vld [vmem:[#allocation16 + $0x38] sm:$0xff]  }
 0x4b2   : > { %v2941_v29 = vsel %vm1085_vm1, %v2939_v7, %v2940_v10 }
 0x4b3   : > { %3233 = vmatprep.mubr.bf16.mxu0 %v2941_v29  ;;  %v2947_v16 = vsel %vm1085_vm1, %v2945_v40, %v2946_v12 }
 0x4b4   : > { %3234 = vmatmul.mubr.bf16.vlgmr.msra.gmra.mrb[32].mxu0 %v2928_v55  ;;  %3281 = vmatprep.mubr.bf16.mxu1 %v2947_v16 }
 0x4b5   : > { %4939 = vmatpush3.bf16.msra.mxu0 %v6382_v61  ;;  %3241 = vmatprep.mubr.bf16.mxu0 %v2940_v10  ;;  %v5302_v61 = vld [vmem:[#allocation14 + $0x130] sm:$0xff]  }
 0x4b6   : > { %3282 = vmatmul.mubr.bf16.vlgmr.msra.gmra.mrb[24].mxu1 %v2944_v8  ;;  %4940 = vmatprep.subr.bf16.mxu0 %v5297_v15 }
 0x4b7   : > { %3289 = vmatprep.mubr.bf16.mxu1 %v2946_v12  ;;  %4777 = vmatpush3.bf16.msra.mxu1 %v5305_v22 }
 0x4b8   : > { %4778 = vmatprep.subr.bf16.mxu1 %v5308_v24 }
 0x4b9   : > { %4941 = vmatpush3.bf16.msra.mxu0 %v5297_v15 }
 0x4ba   : > { %4942 = vmatprep.subr.bf16.mxu0 %v5298_v0 }
 0x4bb   : > { %4779 = vmatpush3.bf16.msra.mxu1 %v5309_v25 }
 0x4bc   : > { %3242 = vmatmul.mubr.bf16.gmra.mrb[36].mxu0 %v2927_v47  ;;  %4780 = vmatprep.subr.bf16.mxu1 %v5312_v28  ;;  %v5329_v47 = vld [vmem:[#allocation16 + $0x30] sm:$0xff]  }
 0x4bd   : > { %4943 = vmatpush3.bf16.msra.mxu0 %v5298_v0  ;;  %4954 = vmatprep.mubr.bf16.mxu0 %v2950_v13 }
 0x4be   : > { %3290 = vmatmul.mubr.bf16.gmra.mrb[28].mxu1 %v2943_v62  ;;  %4944 = vmatprep.subr.bf16.mxu0 %v5299_v17 }
 0x4bf   : > { %4781 = vmatpush3.bf16.msra.mxu1 %v5313_v30 }
 0x4c0   : > { %4782 = vmatprep.subr.bf16.mxu1 %v5316_v34 }
 0x4c1   : > { %4945 = vmatpush3.bf16.msra.mxu0 %v5299_v17 }
 0x4c2   : > { %4946 = vmatprep.subr.bf16.mxu0 %v5300_v18 }
 0x4c3   : > { %4783 = vmatpush3.bf16.msra.mxu1 %v5317_v37 }
 0x4c4   : > { %4784 = vmatprep.subr.bf16.mxu1 %v5320_v35 }
 0x4c5   : > { %4947 = vmatpush3.bf16.msra.mxu0 %v5300_v18 }
 0x4c6   : > { %4948 = vmatprep.subr.bf16.mxu0 %v5301_v19 }
 0x4c7   : > { %4785 = vmatpush3.bf16.msra.mxu1 %v5321_v36 }
 0x4c8   : > { %4786 = vmatprep.subr.bf16.mxu1 %v5324_v42 }
 0x4c9   : > { %4949 = vmatpush3.bf16.msra.mxu0 %v5301_v19 }
 0x4ca   : > { %4950 = vmatprep.subr.bf16.mxu0 %v5302_v61 }
 0x4cb   : > { %4787 = vmatpush3.bf16.msra.mxu1 %v5325_v43 }
 0x4cc   : > { %4788 = vmatprep.subr.bf16.mxu1 %v5328_v45 }
 0x4cd   : > { %4951 = vmatpush3.bf16.msra.mxu0 %v5302_v61 }
 0x4ce   : > { %4952 = vmatprep.subr.bf16.mxu0 %v5303_v14 }
 0x4cf   : > { %4789 = vmatpush3.bf16.msra.mxu1 %v5329_v47 }
 0x4d0   : > { %4790 = vmatprep.subr.bf16.mxu1 %v5332_v51 }
 0x4d1   : > { %4953 = vmatpush3.bf16.msra.mxu0 %v5303_v14  ;;  %v4456_v14 = vld [vmem:[%s6699_s17] ss:$0 sm:$0xff]  ;;  %s6527_s17 = scalar_lea.hbm %s6707_s9, %s4527_s6 }
 0x4d2   : > { %4798 = vmatprep.subr.bf16.mxu0 %v5306_v23  ;;  %v4457_v23 = vld [vmem:[%s6700_s8] ss:$0 sm:$0xff]  ;;  %s6702_s8 = sld [smem:[#allocation51_spill]] }
 0x4d3   : > { %4791 = vmatpush3.bf16.msra.mxu1 %v5333_v53 }
 0x4d4   : > { %4955 = vmatmul.mubr.bf16.vlgmr.msra.gmra.mrb[40].mxu0 %v2949_v1  ;;  %4958 = vmatprep.subr.bf16.mxu1 %v5758_v39 }
 0x4d5   : > { %4799 = vmatpush3.bf16.msra.mxu0 %v5307_v20 }
 0x4d6   : > { %4800 = vmatprep.subr.bf16.mxu0 %v5310_v26 }
 0x4d9   : > { %4801 = vmatpush3.bf16.msra.mxu0 %v5311_v27 }
 0x4da   : > { %4802 = vmatprep.subr.bf16.mxu0 %v5314_v32 }
 0x4dd   : > { %4803 = vmatpush3.bf16.msra.mxu0 %v5315_v33 }
 0x4de   : > { %4804 = vmatprep.subr.bf16.mxu0 %v5318_v31 }
 0x4e1   : > { %4805 = vmatpush3.bf16.msra.mxu0 %v5319_v56 }
 0x4e2   : > { %4806 = vmatprep.subr.bf16.mxu0 %v5322_v38 }
 0x4e5   : > { %4807 = vmatpush3.bf16.msra.mxu0 %v5323_v41 }
 0x4e6   : > { %4808 = vmatprep.subr.bf16.mxu0 %v5326_v44 }
 0x4e9   : > { %4809 = vmatpush3.bf16.msra.mxu0 %v5327_v46 }
 0x4ea   : > { %4810 = vmatprep.subr.bf16.mxu0 %v5330_v48 }
 0x4ed   : > { %4811 = vmatpush3.bf16.msra.mxu0 %v5331_v49 }
 0x4ee   : > { %4812 = vmatprep.subr.bf16.mxu0 %v5334_v52 }
 0x4f1   : > { %4813 = vmatpush3.bf16.msra.mxu0 %v5335_v54 }
 0x4f2   : > { %4978 = vmatprep.subr.bf16.mxu0 %v5758_v39 }
 0x587   : > { %v4726_v55 = vpop.f32.mrb[32].mxu0 }
 0x588   : > { %v4727_v57 = vpop.f32.mrb[33].mxu0 }
 0x589   : > { %v4728_v58 = vadd.f32 %v4727_v57, %v4726_v55  ;;  %v4754_v59 = vpop.f32.mrb[24].mxu1  ;;  %v4729_v62 = vpop.f32.mrb[34].mxu0 }
 0x58a   : > { %v4755_v63 = vpop.f32.mrb[25].mxu1  ;;  %v4730_v1 = vpop.f32.mrb[35].mxu0 }
 0x58b   : > { %v4756_v2 = vadd.f32 %v4755_v63, %v4754_v59  ;;  %v4731_v4 = vadd.f32 %v4730_v1, %v4729_v62  ;;  %v4757_v5 = vpop.f32.mrb[26].mxu1 }
 0x58c   : > { %v4758_v6 = vpop.f32.mrb[27].mxu1 }
 0x58d   : > { %v4759_v7 = vadd.f32 %v4758_v6, %v4757_v5  ;;  %v3284_v8 = vadd.f32 %v4756_v2, %v4728_v58 }
 0x58f   : > { %v4732_v10 = vpop.f32.mrb[36].mxu0  ;;  %v3287_v11 = vadd.f32 %v4759_v7, %v4731_v4 }
 0x590   : > { %v4733_v12 = vpop.f32.mrb[37].mxu0 }
 0x591   : > { %v4734_v13 = vadd.f32 %v4733_v12, %v4732_v10  ;;  %v4760_v40 = vpop.f32.mrb[28].mxu1  ;;  %v4735_v29 = vpop.f32.mrb[38].mxu0 }
 0x592   : > { %v4761_v15 = vpop.f32.mrb[29].mxu1  ;;  %v4736_v16 = vpop.f32.mrb[39].mxu0 }
 0x593   : > { %v4762_v0 = vadd.f32 %v4761_v15, %v4760_v40  ;;  %v4763_v17 = vpop.f32.mrb[30].mxu1 }
 0x594   : > { %v4764_v18 = vpop.f32.mrb[31].mxu1 }
 0x595   : > { %v3292_v19 = vadd.f32 %v4762_v0, %v4734_v13  ;;  %v5336_v18 = vld [vmem:[#allocation16 + $0x100] sm:$0xff]  }
 0x5a7   : > { %v4956_v61 = vpop.f32.mrb[40].mxu0 }
 0x5a8   : > { %v3340_v21 = vadd.f32 %v4956_v61, %v3292_v19  ;;  %v3331_v22 = vpop.f32.mrb[41].mxu0 }
 0x5a9   : > { %v3332_v20 = vadd.f32 %v3331_v22, %v3284_v8  ;;  %v4957_v24 = vpop.f32.mrb[42].mxu0 }
 0x5aa   : > { %v3354_v25 = vmul.f32 %v4456_v14, %v3340_v21  ;;  %v3334_v26 = vpop.f32.mrb[43].mxu0  ;;  %v5337_v21 = vld [vmem:[%s6701_s23] sm:$0xff]   ;;  %v5340_v24 = vld [vmem:[#allocation16 + $0x110] sm:$0xff]  }
 0x5ab   : > { %v3352_v27 = vmul.f32 %v4456_v14, %v3332_v20  ;;  %v3335_v28 = vadd.f32 %v3334_v26, %v3287_v11  ;;  %v5339_v20 = vld [vmem:[%s6701_s23 + $0x8] sm:$0xff]   ;;  %v5342_v26 = vld [vmem:[#allocation16 + $0x118] sm:$0xff]  }
 0x5ac   : > { %v3364_v30 = vadd.f32 %v4457_v23, %v3354_v25  ;;  %v5341_v25 = vld [vmem:[%s6701_s23 + $0x10] sm:$0xff]  }
 0x5ad   : > { %v3362_v32 = vadd.f32 %v4457_v23, %v3352_v27  ;;  %v3353_v33 = vmul.f32 %v4456_v14, %v3335_v28  ;;  %v5343_v27 = vld [vmem:[%s6701_s23 + $0x18] sm:$0xff]   ;;  %v5344_v28 = vld [vmem:[#allocation16 + $0x120] sm:$0xff]  }
 0x5ae   : > { %5374 = vtanh.f32 %v3364_v30  ;;  %v5345_v30 = vld [vmem:[%s6701_s23 + $0x20] sm:$0xff]  }
 0x5af   : > { %5376 = vtanh.f32 %v3362_v32  ;;  %v3363_v34 = vadd.f32 %v4457_v23, %v3353_v33  ;;  %v5338_v23 = vld [vmem:[#allocation16 + $0x108] sm:$0xff]  }
 0x5b0   : > { %v5346_v32 = vld [vmem:[#allocation16 + $0x128] sm:$0xff]  }
 0x5b1   : > { %5378 = vtanh.f32 %v3363_v34  ;;  %v5347_v33 = vld [vmem:[%s6701_s23 + $0x28] sm:$0xff]   ;;  %v5348_v34 = vld [vmem:[#allocation16 + $0x130] sm:$0xff]  }
 0x5b8   : > { %v5375_v37 = vpop.eup %5374 }
 0x5b9   : > { %v5377_v31 = vpop.eup %5376  ;;  %v3374_v36 = vrot.slane %v5375_v37, 4  ;;  %v5349_v37 = vld [vmem:[%s6701_s23 + $0x30] sm:$0xff]  }
 0x5ba   : > { %v3371_v56 = vrot.slane %v5377_v31, 4  ;;  %v5350_v31 = vld [vmem:[#allocation16 + $0x138] sm:$0xff]  }
 0x5bb   : > { %v5379_v35 = vpop.eup %5378 }
 0x5bc   : > { %v3372_v38 = vrot.slane %v5379_v35, 4  ;;  %v3379_v41 = vsel %vm1009_vm3, %v3371_v56, 0.0 }
 0x5be   : > { %v3373_v42 = vsel %vm1409_vm4, %v3371_v56, %v3372_v38  ;;  %v3375_v43 = vsel %vm1409_vm4, %v3372_v38, %v3374_v36  ;;  %v5351_v56 = vld [vmem:[%s6701_s23 + $0x38] sm:$0xff]  }
 0x5bf   : > { %v3381_v44 = vsel %vm1015_vm5, %v3375_v43, 0.0  ;;  %v3382_v46 = vpack.c.bf16 %v3373_v42, %v3379_v41 }
 0x5c0   : > { %v3383_v45 = vpack.c.bf16 %v3381_v44, %v3381_v44 }
 0x5c1   : > { %v3465_v47 = vshrl.u32 %v3382_v46, 16  ;;  %v3467_v48 = vshll.u32 %v3382_v46, 16  ;;  %v3491_v49 = vrot.slane %v3382_v46, 2  ;;  %v3481_v51 = vrot.slane %v3382_v46, 1 }
 0x5c2   : > { %v3472_v52 = vshll.u32 %v3383_v45, 16  ;;  %v3476_v53 = vshrl.u32 %v3383_v45, 16  ;;  %v3492_v54 = vrot.slane %v3383_v45, 2  ;;  %v3482_v55 = vrot.slane %v3383_v45, 1 }
 0x5c3   : > { %v3469_v57 = vrot.slane %v3467_v48, 1  ;;  %v3484_v58 = vrot.slane %v3465_v47, 1  ;;  %v3485_v59 = vrot.slane %v3467_v48, 2 }
 0x5c4   : > { %v3474_v62 = vrot.slane %v3472_v52, 1  ;;  %v3493_v63 = vsel %vm1491_vm6, %v3491_v49, %v3492_v54  ;;  %v3487_v1 = vrot.slane %v3476_v53, 1  ;;  %v3488_v2 = vrot.slane %v3472_v52, 2 }
 0x5c5   : > { %v3470_v4 = vor.u32 %v3469_v57, %v3465_v47  ;;  %v3503_v5 = vrot.slane %v3493_v63, 2  ;;  %v3486_v6 = vor.u32 %v3485_v59, %v3484_v58  ;;  %v3483_v7 = vsel %vm1085_vm1, %v3481_v51, %v3482_v55  ;;  %v4509_v58 = vld [vmem:[%s6704_s29] ss:$0 sm:$0xff] }
 0x5c6   : > { %v3478_v8 = vor.u32 %v3476_v53, %v3474_v62  ;;  %v3489_v10 = vor.u32 %v3488_v2, %v3487_v1  ;;  %v3497_v11 = vrot.slane %v3483_v7, 2  ;;  %v3498_v12 = vrot.slane %v3482_v55, 2  ;;  %v4499_v59 = vld [vmem:[%s6705_s16] ss:$0 sm:$0xff] }
 0x5c7   : > { %v3475_v13 = vsel %vm1069_vm0, %v3470_v4, %v3474_v62  ;;  %v3504_v40 = vrot.slane %v3492_v54, 2 }
 0x5c8   : > { %v3494_v29 = vrot.slane %v3475_v13, 2  ;;  %v3495_v15 = vrot.slane %v3478_v8, 2  ;;  %v3490_v16 = vsel %vm1089_vm2, %v3486_v6, %v3489_v10  ;;  %v3501_v0 = vrot.slane %v3489_v10, 2 }
 0x5c9   : > { %v3500_v17 = vrot.slane %v3490_v16, 2  ;;  %v3499_v19 = vsel %vm1491_vm6, %v3497_v11, %v3498_v12  ;;  %v3505_v61 = vsel %vm1491_vm6, %v3503_v5, %v3504_v40 }
 0x5ca   : > { %v3496_v14 = vsel %vm1491_vm6, %v3494_v29, %v3495_v15 }
 0x5cb   : > { %3783 = vmatprep.mubr.bf16.mxu1 %v3496_v14  ;;  %v3502_v22 = vsel %vm1491_vm6, %v3500_v17, %v3501_v0 }
 0x5cc   : > { %3784 = vmatmul.mubr.bf16.vlgmr.msra.gmra.mrb[32].mxu1 %v3493_v63  ;;  %3824 = vmatprep.mubr.bf16.mxu0 %v3502_v22 }
 0x5cd   : > { %4959 = vmatpush3.bf16.msra.mxu1 %v5336_v18  ;;  %3825 = vmatmul.mubr.bf16.vlgmr.msra.gmra.mrb[44].mxu0 %v3499_v19 }
 0x5ce   : > { %4979 = vmatpush3.bf16.msra.mxu0 %v5337_v21  ;;  %4960 = vmatprep.subr.bf16.mxu1 %v5758_v39 }
 0x5cf   : > { %4980 = vmatprep.subr.bf16.mxu0 %v5758_v39  ;;  %4974 = vmatprep.mubr.msk.bf16.mxu1 %vm5759_vm8, %v5758_v39 }
 0x5d0   : > { %4994 = vmatprep.mubr.msk.bf16.mxu0 %vm5759_vm8, %v5758_v39 }
 0x5d1   : > { %4961 = vmatpush3.bf16.msra.mxu1 %v5338_v23 }
 0x5d2   : > { %4981 = vmatpush3.bf16.msra.mxu0 %v5339_v20  ;;  %4962 = vmatprep.subr.bf16.mxu1 %v5758_v39 }
 0x5d3   : > { %4982 = vmatprep.subr.bf16.mxu0 %v5758_v39 }
 0x5d5   : > { %4963 = vmatpush3.bf16.msra.mxu1 %v5340_v24 }
 0x5d6   : > { %4983 = vmatpush3.bf16.msra.mxu0 %v5341_v25  ;;  %4964 = vmatprep.subr.bf16.mxu1 %v5758_v39 }
 0x5d7   : > { %4984 = vmatprep.subr.bf16.mxu0 %v5758_v39 }
 0x5d9   : > { %4965 = vmatpush3.bf16.msra.mxu1 %v5342_v26 }
 0x5da   : > { %4985 = vmatpush3.bf16.msra.mxu0 %v5343_v27  ;;  %4966 = vmatprep.subr.bf16.mxu1 %v5758_v39 }
 0x5db   : > { %4986 = vmatprep.subr.bf16.mxu0 %v5758_v39 }
 0x5dd   : > { %4967 = vmatpush3.bf16.msra.mxu1 %v5344_v28 }
 0x5de   : > { %4987 = vmatpush3.bf16.msra.mxu0 %v5345_v30  ;;  %4968 = vmatprep.subr.bf16.mxu1 %v5758_v39 }
 0x5df   : > { %4988 = vmatprep.subr.bf16.mxu0 %v5758_v39 }
 0x5e1   : > { %4969 = vmatpush3.bf16.msra.mxu1 %v5346_v32 }
 0x5e2   : > { %4989 = vmatpush3.bf16.msra.mxu0 %v5347_v33  ;;  %4970 = vmatprep.subr.bf16.mxu1 %v5758_v39 }
 0x5e3   : > { %4990 = vmatprep.subr.bf16.mxu0 %v5758_v39 }
 0x5e5   : > { %4971 = vmatpush3.bf16.msra.mxu1 %v5348_v34 }
 0x5e6   : > { %4991 = vmatpush3.bf16.msra.mxu0 %v5349_v37  ;;  %4972 = vmatprep.subr.bf16.mxu1 %v5758_v39 }
 0x5e7   : > { %4992 = vmatprep.subr.bf16.mxu0 %v5758_v39  ;;  %v4508_v39 = vld [vmem:[%s6702_s8] ss:$0 sm:$0xff]  ;;  %s5760_s8 = smov [#allocation17]  }
 0x5e8   : > { %s5647_s21 = sshll.u32 %s5760_s8, 4  ;;  %s5648_s21 = int_to_ptr.vmem [resolvable:$false] %s5647_s21 }
 0x5e9   : > { %4973 = vmatpush3.bf16.msra.mxu1 %v5350_v31  ;;  %s5649_s26 = scalar_lea.vmem %s5648_s21, 512  ;;  %p5650_p9 = scmp.lt.s32.totalorder %s6529_s10, %s5648_s21 }
 0x5ea   : > { %4993 = vmatpush3.bf16.msra.mxu0 %v5351_v56  ;;  %p5651_p1 = scmp.lt.s32.totalorder %s5649_s26, %s5643_s1 }
 0x5ec   : > { %4975 = vmatmul.mubr.bf16.vlgmr.msra.gmra.mrb[36].mxu1 %v3505_v61  ;;  %p5652_p10 = por %p5651_p1, %p5650_p9 }
 0x5ed   : > { %4995 = vmatmul.mubr.bf16.vlgmr.msra.gmra.mrb[48].mxu0 %v6431_v9  ;;  %v4498_v9 = vld [vmem:[%s6703_s24] ss:$0 sm:$0xff] }
 0x5ee   : > { %p5653_p11 = pnand %p5652_p10, %p5646_p4 }
 0x69f   : > { %v4792_v35 = vpop.f32.mrb[32].mxu1 }
 0x6a0   : > { %v4793_v36 = vpop.f32.mrb[33].mxu1  ;;  %v4814_v38 = vpop.f32.mrb[44].mxu0 }
 0x6a1   : > { %v4794_v41 = vadd.f32 %v4793_v36, %v4792_v35  ;;  %v4795_v42 = vpop.f32.mrb[34].mxu1  ;;  %v4815_v43 = vpop.f32.mrb[45].mxu0 }
 0x6a2   : > { %v4816_v44 = vadd.f32 %v4815_v43, %v4814_v38  ;;  %v4796_v46 = vpop.f32.mrb[35].mxu1  ;;  %v4817_v45 = vpop.f32.mrb[46].mxu0 }
 0x6a3   : > { %v4797_v47 = vadd.f32 %v4796_v46, %v4795_v42  ;;  %v4818_v48 = vpop.f32.mrb[47].mxu0 }
 0x6a4   : > { %v4819_v49 = vadd.f32 %v4818_v48, %v4817_v45  ;;  %v3827_v51 = vadd.f32 %v4816_v44, %v4794_v41 }
 0x6a6   : > { %v3830_v52 = vadd.f32 %v4819_v49, %v4797_v47 }
 0x6bf   : > { %v3867_v53 = vpop.f32.mrb[36].mxu1 }
 0x6c0   : > { %v3868_v54 = vadd.f32 %v3867_v53, %v3827_v51  ;;  %v4976_v55 = vpop.f32.mrb[37].mxu1  ;;  %v3994_v57 = vpop.f32.mrb[48].mxu0 }
 0x6c1   : > { %v4008_v62 = vmul.f32 %v4508_v39, %v3994_v57  ;;  %v3870_v63 = vpop.f32.mrb[38].mxu1  ;;  %v4996_v1 = vpop.f32.mrb[49].mxu0 }
 0x6c2   : > { %v3881_v2 = vmul.f32 %v4498_v9, %v3868_v54  ;;  %v3871_v4 = vadd.f32 %v3870_v63, %v3830_v52  ;;  %v4977_v5 = vpop.f32.mrb[39].mxu1  ;;  %v3997_v6 = vpop.f32.mrb[50].mxu0 }
 0x6c3   : > { %v4017_v7 = vadd.f32 %v4509_v58, %v4008_v62  ;;  %v4009_v8 = vmul.f32 %v4508_v39, %v3997_v6  ;;  %v4997_v10 = vpop.f32.mrb[51].mxu0 }
 0x6c4   : > { %v3890_v11 = vadd.f32 %v4499_v59, %v3881_v2  ;;  %v3882_v12 = vmul.f32 %v4498_v9, %v3871_v4 }
 0x6c5   : > { %v4018_v13 = vadd.f32 %v4509_v58, %v4009_v8 }
 0x6c6   : > { %v4019_v40 = vadd.f32 %v4017_v7, %v3890_v11  ;;  %v3891_v29 = vadd.f32 %v4499_v59, %v3882_v12 }
 0x6c8   : > { %5380 = vtanh.f32 %v4019_v40  ;;  %v4020_v15 = vadd.f32 %v4018_v13, %v3891_v29 }
 0x6ca   : > { %5382 = vtanh.f32 %v4020_v15 }
 0x6d2   : > { %v5381_v16 = vpop.eup %5380 }
 0x6d3   : > { %v4025_v0 = vrot.slane %v5381_v16, 2 }
 0x6d4   : > { %v5383_v17 = vpop.eup %5382 }
 0x6d5   : > { %v4031_v18 = vsel %vm1009_vm3, %v4025_v0, 0.0  ;;  %v4026_v19 = vrot.slane %v5383_v17, 2 }
 0x6d6   : > { %v4524_v61 = vpack.c.bf16 %v4031_v18, %v4031_v18 }
 0x6d7   : > { %v4027_v14 = vsel %vm1491_vm6, %v4025_v0, %v4026_v19  ;;  %v4033_v21 = vsel %vm1015_vm5, %v4026_v19, 0.0 }
 0x6d8   : > { %v4525_v22 = vpack.c.bf16 %v4027_v14, %v4027_v14  ;;  %v4526_v23 = vpack.c.bf16 %v4033_v21, %v4033_v21  ;;  %v4513_v20 = vrot.slane %v4524_v61, 11 }
 0x6da   : > { %v4046_v24 = vrot.slane %v4525_v22, 7  ;;  %v4049_v26 = vrot.slane %v4526_v23, 7 }
 0x6dc   : > { %v4047_v60 = vsel %vm6403_vm12, %v4513_v20, %v4046_v24  ;;  %v4048_v25 = vrot.slane %v4046_v24, 4 }
 0x6dd   : > { %4053 = vst [vmem:[%s6409_s18 + $0x4] sm:$0xf] %v4047_v60 }
 0x6de   : > { %v4050_v3 = vsel %vm6403_vm12, %v4048_v25, %v4049_v26 }
 0x6df   : > { %4054 = vst [vmem:[%s6409_s18 + $0xc] sm:$0xf] %v4050_v3 }
 0x6e0   : > { %5656 = shalt.err (!%p5653_p11)
}
 0x6e1   : > { %s5657_s18 = scalar_lea.hbm %s6527_s17, 256  ;;  %s5661_s11 = scalar_lea.hbm %s6707_s9, 512 }
 0x6e2   : > { %p5658_p8 = scmp.ne.s32.totalorder %s6527_s17, %s5657_s18  ;;  %p5662_p13 = scmp.lt.u32.totalorder %s6527_s17, %s6707_s9 }
 0x6e3   : > { %p5663_p6 = scmp.lt.u32.totalorder %s5661_s11, %s5657_s18  ;;  %p5665_p7 = scmp.lt.u32.totalorder %s5657_s18, %s6527_s17 }
 0x6e4   : > { %p5659_p3 = pnand %p5658_p8, %p6708_p5 }
 0x6e5   : > { %p5664_p0 = por %p5663_p6, %p5662_p13 }
 0x6e6   : > { %p5660_p12 = pneg %p5659_p3 }
 0x6e7   : > { %p5666_p2 = por %p5665_p7, %p5664_p0 }
 0x6e9   : > { %p5667_p4 = pnand %p5666_p2, %p5660_p12 }
 0x6eb   : > { %5670 = shalt.err (!%p5667_p4)
}
 0x6ec   : > { %s5761_s19 = smov 128   ;;  %s5762_s16 = smov 8  }
 0x6ed   : > { %5030 = dma.vmem_to_hbm [thread:$0]  (%p6708_p5), %s6529_s10, 256, %s6527_s17, %s4056_s22, %s5761_s19, %s5761_s19, %s5762_s16  }
 0x6ee PF: > { %s4087_s25 = sand.u32 1, %s5725_s27   ;;  %p6709_p9 = scmp.ne.s32.totalorder %s6674_s30, 0 }
 0x6ef   : > { %p6710_p1 = scmp.ge.s32.totalorder %s5745_s4, 2  ;;  %s4088_s6 = scalar_lea.sflag [#allocation4], %s4087_s25 }
 0x6f1   : > { %p5062_p10 = pnand %p6710_p1, %p6709_p9 }
 0x6f3   : > { %5720 = dma.done.wait (!%p5062_p10), %s4088_s6, 256  }
 0x6f4   : > { %5722 = vsyncadd (!%p5062_p10), %s4088_s6, 4294967040  ;;  %s48_s4 = sadd.s32 1, %s5745_s4   ;;  %s6711_s20 = sld [smem:[#allocation28_spill]] }
 0x6f5   : > { %p45_p11 = scmp.ge.s32.totalorder %s48_s4, 4   ;;  %s6712_s28 = sld [smem:[#allocation26_spill]] }
 0x6f6   : > { %s6713_s8 = sld [smem:[#allocation27_spill]]  ;;  %s6714_s27 = smov %s5729_s3 }
 0x6f7   : > { %s6715_s3 = smov %s5733_s7  ;;  %47 = sbr.rel (!%p45_p11) target bundleno = 37 (0x25), region = 210 }
 0x6fa   : > { %s6716_s7 = smov %s6711_s20 }
 0x6fe   :  { %4093 = vsyncpa [#allocation3], 1 }
 0x6ff   :  { %4095 = vsyncpa [#allocation3 + $0x1], 1 }
 0x700   :  { %4096 = vsyncpa [#allocation6], 1 }
 0x701   :  { %4098 = vsyncpa [#allocation6 + $0x1], 1 }
 0x702   :  { %4099 = vsyncpa [#allocation9], 1 }
 0x703   :  { %4100 = vsyncpa [#allocation12], 1 }
 0x704   :  { %4101 = vsyncpa [#allocation15], 1 }
 0x705   :  { %4102 = vsyncpa [#allocation4], 1 }
 0x706   :  { %4104 = vsyncpa [#allocation4 + $0x1], 1 }

</bundles_post_ra>
